<compile_context>
chip_gen: v7x
topology: tpu7x:2x2x1
jax: 0.10.0
libtpu: 0.0.40
codegen_flags: <defaults>
</compile_context>

<pallas_src>
import jax
import jax.numpy as jnp
from jax.experimental import pallas as pl
from jax.experimental.pallas import tpu as pltpu

BN_EPS = 1e-5

# Model dims (PyTorch module defaults).
D_IN = 63
H1, H2, H3 = 256, 512, 256
LATENT = 10

# Lane-dense padded dims.
D_IN_PAD = 128
LAT_PAD = 128            # per-head (mu / logvar) padding


def _linear(h, w_ref, b_ref):
    """h (f32) @ W (bf16) + b (f32), f32 MXU accumulation."""
    return jnp.dot(h.astype(jnp.bfloat16), w_ref[...],
                   preferred_element_type=jnp.float32) + b_ref[...]


def _batch_norm(h, g_ref, b_ref):
    """Training-mode BatchNorm1d: batch mean, biased batch variance, affine.

    var = E[h^2] - mean^2 (one pass over h), gamma*rsqrt folded into a single
    scale vector so the normalize is one multiply-add per element.
    """
    mean = jnp.mean(h, axis=0, keepdims=True)
    var = jnp.mean(h * h, axis=0, keepdims=True) - mean * mean
    scale = g_ref[...] * jax.lax.rsqrt(var + BN_EPS)
    shift = b_ref[...] - mean * scale
    return h * scale + shift


def vae_forward_kernel(
    # inputs
    x_ref, eps_ref,
    w1_ref, b1_ref, g1_ref, be1_ref,
    w2_ref, b2_ref, g2_ref, be2_ref,
    w3_ref, b3_ref, g3_ref, be3_ref,
    whead_ref, bhead_ref,
    w5_ref, b5_ref, w6_ref, b6_ref, w7_ref, b7_ref, w8_ref, b8_ref,
    # outputs
    recon_ref, mu_ref, logvar_ref,
):
    x = x_ref[...]

    # ---------------- encoder ----------------
    h = jnp.maximum(_batch_norm(_linear(x, w1_ref, b1_ref), g1_ref, be1_ref), 0.0)
    h = jnp.maximum(_batch_norm(_linear(h, w2_ref, b2_ref), g2_ref, be2_ref), 0.0)
    h = jnp.maximum(_batch_norm(_linear(h, w3_ref, b3_ref), g3_ref, be3_ref), 0.0)

    # fused (mu | logvar) head: single matmul, 128-lane-aligned slices
    head = _linear(h, whead_ref, bhead_ref)          # [B, 2*LAT_PAD]
    mu = head[:, :LAT_PAD]
    logvar = head[:, LAT_PAD:]

    # ---------------- reparameterize ----------------
    std = jnp.exp(0.5 * logvar)
    z = mu + eps_ref[...] * std                      # pad lanes: 0 + 0*1 = 0

    # ---------------- decoder ----------------
    d = jnp.maximum(_linear(z, w5_ref, b5_ref), 0.0)
    d = jnp.maximum(_linear(d, w6_ref, b6_ref), 0.0)
    d = jnp.maximum(_linear(d, w7_ref, b7_ref), 0.0)
    recon = jax.nn.sigmoid(_linear(d, w8_ref, b8_ref))

    # lane-dense (128-wide) unmasked stores; padding removed in wrapper
    recon_ref[...] = recon
    mu_ref[...] = mu
    logvar_ref[...] = logvar


PACKED_KEYS = (
    "w1", "b1", "g1", "be1",
    "w2", "b2", "g2", "be2",
    "w3", "b3", "g3", "be3",
    "whead", "bhead",
    "w5", "b5", "w6", "b6", "w7", "b7", "w8", "b8",
)


def pack_params(p):
    """Pad / fuse / cast raw ([in,out] f32) params for the kernel (host-side, once).

    Weights -> bf16 for the MXU; biases and BatchNorm affine params stay f32.
    Zero padding keeps the math exact: padded input lanes / weight rows
    contribute nothing, and padded logvar lanes are 0 -> std 1, eps 0 -> z 0.
    """
    def pad_to(a, shape):
        return jnp.pad(a, [(0, t - s) for s, t in zip(a.shape, shape)])

    wmu = pad_to(p["wmu"], (H3, LAT_PAD))
    wlv = pad_to(p["wlv"], (H3, LAT_PAD))
    bmu = pad_to(p["bmu"], (1, LAT_PAD))
    blv = pad_to(p["blv"], (1, LAT_PAD))

    return {
        "w1": pad_to(p["w1"], (D_IN_PAD, H1)).astype(jnp.bfloat16),
        "b1": p["b1"], "g1": p["g1"], "be1": p["be1"],
        "w2": p["w2"].astype(jnp.bfloat16),
        "b2": p["b2"], "g2": p["g2"], "be2": p["be2"],
        "w3": p["w3"].astype(jnp.bfloat16),
        "b3": p["b3"], "g3": p["g3"], "be3": p["be3"],
        "whead": jnp.concatenate([wmu, wlv], axis=1).astype(jnp.bfloat16),
        "bhead": jnp.concatenate([bmu, blv], axis=1),
        "w5": pad_to(p["w5"], (LAT_PAD, H3)).astype(jnp.bfloat16),
        "b5": p["b5"],
        "w6": p["w6"].astype(jnp.bfloat16), "b6": p["b6"],
        "w7": p["w7"].astype(jnp.bfloat16), "b7": p["b7"],
        "w8": pad_to(p["w8"], (H1, D_IN_PAD)).astype(jnp.bfloat16),
        "b8": pad_to(p["b8"], (1, D_IN_PAD)),
    }


@jax.jit
def vae_forward(x, eps, packed):
    B = x.shape[0]
    x_pad = jnp.pad(x.astype(jnp.float32), ((0, 0), (0, D_IN_PAD - D_IN)))
    eps_pad = jnp.pad(eps.astype(jnp.float32), ((0, 0), (0, LAT_PAD - LATENT)))

    inputs = (x_pad, eps_pad) + tuple(packed[k] for k in PACKED_KEYS)

    vmem = pl.BlockSpec(memory_space=pltpu.MemorySpace.VMEM)

    out_shapes = (
        jax.ShapeDtypeStruct((B, D_IN_PAD), jnp.float32),  # recon (padded)
        jax.ShapeDtypeStruct((B, LAT_PAD), jnp.float32),   # mu (padded)
        jax.ShapeDtypeStruct((B, LAT_PAD), jnp.float32),   # logvar (padded)
    )

    # Advisory cost estimate so XLA can schedule around this small call.
    layer_dims = ((D_IN_PAD, H1), (H1, H2), (H2, H3), (H3, 2 * LAT_PAD),
                  (LAT_PAD, H3), (H3, H2), (H2, H1), (H1, D_IN_PAD))
    flops = 2 * B * sum(i * o for i, o in layer_dims)
    in_bytes = sum(a.size * a.dtype.itemsize for a in inputs)
    out_bytes = sum(B * s.shape[1] * 4 for s in out_shapes)
    cost = pl.CostEstimate(
        flops=flops,
        transcendentals=B * (LAT_PAD + D_IN_PAD) + (H1 + H2 + H3),
        bytes_accessed=in_bytes + out_bytes,
    )

    recon_p, mu_p, logvar_p = pl.pallas_call(
        vae_forward_kernel,
        out_shape=out_shapes,
        in_specs=[vmem] * len(inputs),
        out_specs=(vmem, vmem, vmem),
        compiler_params=pltpu.CompilerParams(vmem_limit_bytes=16 << 20),
        cost_estimate=cost,
    )(*inputs)

    # TODO(synk): for repeated calls at small batch, pin weights in VMEM across
    # calls (cross-call prefetch / persistent scratch) to avoid re-DMA per step.
    return recon_p[:, :D_IN], mu_p[:, :LATENT], logvar_p[:, :LATENT]


def init_params(key, input_dim=D_IN, h1=H1, h2=H2, h3=H3, latent=LATENT):
    """Deterministic init mimicking nn.Linear default (U[-1/sqrt(fan_in), +])."""
    dims = {
        "1": (input_dim, h1), "2": (h1, h2), "3": (h2, h3),
        "mu": (h3, latent), "lv": (h3, latent),
        "5": (latent, h3), "6": (h3, h2), "7": (h2, h1), "8": (h1, input_dim),
    }
    params = {}
    for name, (fan_in, fan_out) in dims.items():
        key, kw, kb = jax.random.split(key, 3)
        bound = 1.0 / jnp.sqrt(fan_in)
        params[f"w{name}"] = jax.random.uniform(
            kw, (fan_in, fan_out), jnp.float32, -bound, bound)
        params[f"b{name}"] = jax.random.uniform(
            kb, (1, fan_out), jnp.float32, -bound, bound)
    # BatchNorm1d affine params (PyTorch default: gamma=1, beta=0)
    for name, dim in (("1", h1), ("2", h2), ("3", h3)):
        params[f"g{name}"] = jnp.ones((1, dim), jnp.float32)
        params[f"be{name}"] = jnp.zeros((1, dim), jnp.float32)
    return params


def vae_forward_ref(x, eps, p):
    """Pure-JAX f32 reference matching the PyTorch forward (training-mode BN)."""
    def bn(h, g, b):
        mean = jnp.mean(h, axis=0, keepdims=True)
        var = jnp.mean((h - mean) ** 2, axis=0, keepdims=True)
        return (h - mean) / jnp.sqrt(var + BN_EPS) * g + b

    h = jax.nn.relu(bn(x @ p["w1"] + p["b1"], p["g1"], p["be1"]))
    h = jax.nn.relu(bn(h @ p["w2"] + p["b2"], p["g2"], p["be2"]))
    h = jax.nn.relu(bn(h @ p["w3"] + p["b3"], p["g3"], p["be3"]))
    mu = h @ p["wmu"] + p["bmu"]
    logvar = h @ p["wlv"] + p["blv"]
    z = mu + eps * jnp.exp(0.5 * logvar)
    d = jax.nn.relu(z @ p["w5"] + p["b5"])
    d = jax.nn.relu(d @ p["w6"] + p["b6"])
    d = jax.nn.relu(d @ p["w7"] + p["b7"])
    return jax.nn.sigmoid(d @ p["w8"] + p["b8"]), mu, logvar


if __name__ == "__main__":
    key = jax.random.PRNGKey(0)
    k_params, k_x, k_eps = jax.random.split(key, 3)

    B = 16
    params = init_params(k_params)
    packed = pack_params(params)

    x = jax.random.normal(k_x, (B, D_IN), jnp.float32)
    eps = jax.random.normal(k_eps, (B, LATENT), jnp.float32)  # torch.randn_like

    recon, mu, logvar = vae_forward(x, eps, packed)
    jax.block_until_ready((recon, mu, logvar))

    assert recon.shape == (B, D_IN)
    assert mu.shape == (B, LATENT)
    assert logvar.shape == (B, LATENT)
    assert bool(jnp.all(jnp.isfinite(recon)))
    assert bool(jnp.all((recon >= 0.0) & (recon <= 1.0)))  # sigmoid range

    # Sanity-check against the f32 reference (bf16 MXU weights -> loose tol).
    recon_r, mu_r, logvar_r = vae_forward_ref(x, eps, params)
    assert float(jnp.max(jnp.abs(recon - recon_r))) < 0.1
    assert float(jnp.max(jnp.abs(mu - mu_r))) < 0.1
    assert float(jnp.max(jnp.abs(logvar - logvar_r))) < 0.1

    print("KERNEL_OK")
</pallas_src>

<mosaic_0001>
module attributes {stable_mosaic.version = 11 : i64} {
  func.func @vae_forward_kernel(%arg0: memref<16x128xf32, #tpu.memory_space<vmem>>, %arg1: memref<16x128xf32, #tpu.memory_space<vmem>>, %arg2: memref<128x256xbf16, #tpu.memory_space<vmem>>, %arg3: memref<1x256xf32, #tpu.memory_space<vmem>>, %arg4: memref<1x256xf32, #tpu.memory_space<vmem>>, %arg5: memref<1x256xf32, #tpu.memory_space<vmem>>, %arg6: memref<256x512xbf16, #tpu.memory_space<vmem>>, %arg7: memref<1x512xf32, #tpu.memory_space<vmem>>, %arg8: memref<1x512xf32, #tpu.memory_space<vmem>>, %arg9: memref<1x512xf32, #tpu.memory_space<vmem>>, %arg10: memref<512x256xbf16, #tpu.memory_space<vmem>>, %arg11: memref<1x256xf32, #tpu.memory_space<vmem>>, %arg12: memref<1x256xf32, #tpu.memory_space<vmem>>, %arg13: memref<1x256xf32, #tpu.memory_space<vmem>>, %arg14: memref<256x256xbf16, #tpu.memory_space<vmem>>, %arg15: memref<1x256xf32, #tpu.memory_space<vmem>>, %arg16: memref<128x256xbf16, #tpu.memory_space<vmem>>, %arg17: memref<1x256xf32, #tpu.memory_space<vmem>>, %arg18: memref<256x512xbf16, #tpu.memory_space<vmem>>, %arg19: memref<1x512xf32, #tpu.memory_space<vmem>>, %arg20: memref<512x256xbf16, #tpu.memory_space<vmem>>, %arg21: memref<1x256xf32, #tpu.memory_space<vmem>>, %arg22: memref<256x128xbf16, #tpu.memory_space<vmem>>, %arg23: memref<1x128xf32, #tpu.memory_space<vmem>>, %arg24: memref<16x128xf32, #tpu.memory_space<vmem>>, %arg25: memref<16x128xf32, #tpu.memory_space<vmem>>, %arg26: memref<16x128xf32, #tpu.memory_space<vmem>>) attributes {dimension_semantics = [], scalar_prefetch = 0 : i64, scratch_operands = 0 : i64, tpu.core_type = #tpu.core_type<tc>} {
    %c0 = arith.constant 0 : index
    %c0_0 = arith.constant 0 : index
    %0 = vector.load %arg0[%c0, %c0_0] : memref<16x128xf32, #tpu.memory_space<vmem>>, vector<16x128xf32>
    %1 = arith.truncf %0 : vector<16x128xf32> to vector<16x128xbf16>
    %c0_1 = arith.constant 0 : index
    %c0_2 = arith.constant 0 : index
    %2 = vector.load %arg2[%c0_1, %c0_2] : memref<128x256xbf16, #tpu.memory_space<vmem>>, vector<128x256xbf16>
    %cst = arith.constant dense<0.000000e+00> : vector<16x256xf32>
    %3 = tpu.matmul %1, %2, %cst {dimension_numbers = #tpu.dot_dimension_numbers<[1], [0], [0], [1], [0, 0, 1, 1], [], []>} : vector<16x128xbf16>, vector<128x256xbf16>, vector<16x256xf32> -> vector<16x256xf32>
    %c0_3 = arith.constant 0 : index
    %c0_4 = arith.constant 0 : index
    %4 = vector.load %arg3[%c0_3, %c0_4] : memref<1x256xf32, #tpu.memory_space<vmem>>, vector<1x256xf32>
    %5 = vector.broadcast %4 : vector<1x256xf32> to vector<16x256xf32>
    %6 = arith.addf %3, %5 : vector<16x256xf32>
    %cst_5 = arith.constant dense<0.000000e+00> : vector<256xf32>
    %7 = vector.multi_reduction <add>, %6, %cst_5 [0] : vector<16x256xf32> to vector<256xf32>
    %8 = vector.shape_cast %7 : vector<256xf32> to vector<1x256xf32>
    %cst_6 = arith.constant 1.600000e+01 : f32
    %9 = vector.broadcast %cst_6 : f32 to vector<1x256xf32>
    %10 = arith.divf %8, %9 : vector<1x256xf32>
    %11 = arith.mulf %6, %6 : vector<16x256xf32>
    %cst_7 = arith.constant dense<0.000000e+00> : vector<256xf32>
    %12 = vector.multi_reduction <add>, %11, %cst_7 [0] : vector<16x256xf32> to vector<256xf32>
    %13 = vector.shape_cast %12 : vector<256xf32> to vector<1x256xf32>
    %cst_8 = arith.constant 1.600000e+01 : f32
    %14 = vector.broadcast %cst_8 : f32 to vector<1x256xf32>
    %15 = arith.divf %13, %14 : vector<1x256xf32>
    %16 = arith.mulf %10, %10 : vector<1x256xf32>
    %17 = arith.subf %15, %16 : vector<1x256xf32>
    %c0_9 = arith.constant 0 : index
    %c0_10 = arith.constant 0 : index
    %18 = vector.load %arg4[%c0_9, %c0_10] : memref<1x256xf32, #tpu.memory_space<vmem>>, vector<1x256xf32>
    %cst_11 = arith.constant 9.99999974E-6 : f32
    %19 = vector.broadcast %cst_11 : f32 to vector<1x256xf32>
    %20 = arith.addf %17, %19 : vector<1x256xf32>
    %21 = math.rsqrt %20 : vector<1x256xf32>
    %22 = arith.mulf %18, %21 : vector<1x256xf32>
    %c0_12 = arith.constant 0 : index
    %c0_13 = arith.constant 0 : index
    %23 = vector.load %arg5[%c0_12, %c0_13] : memref<1x256xf32, #tpu.memory_space<vmem>>, vector<1x256xf32>
    %24 = arith.mulf %10, %22 : vector<1x256xf32>
    %25 = arith.subf %23, %24 : vector<1x256xf32>
    %26 = vector.broadcast %22 : vector<1x256xf32> to vector<16x256xf32>
    %27 = arith.mulf %6, %26 : vector<16x256xf32>
    %28 = vector.broadcast %25 : vector<1x256xf32> to vector<16x256xf32>
    %29 = arith.addf %27, %28 : vector<16x256xf32>
    %cst_14 = arith.constant 0.000000e+00 : f32
    %30 = vector.broadcast %cst_14 : f32 to vector<16x256xf32>
    %31 = arith.maximumf %29, %30 : vector<16x256xf32>
    %32 = arith.truncf %31 : vector<16x256xf32> to vector<16x256xbf16>
    %c0_15 = arith.constant 0 : index
    %c0_16 = arith.constant 0 : index
    %33 = vector.load %arg6[%c0_15, %c0_16] : memref<256x512xbf16, #tpu.memory_space<vmem>>, vector<256x512xbf16>
    %cst_17 = arith.constant dense<0.000000e+00> : vector<16x512xf32>
    %34 = tpu.matmul %32, %33, %cst_17 {dimension_numbers = #tpu.dot_dimension_numbers<[1], [0], [0], [1], [0, 0, 1, 1], [], []>} : vector<16x256xbf16>, vector<256x512xbf16>, vector<16x512xf32> -> vector<16x512xf32>
    %c0_18 = arith.constant 0 : index
    %c0_19 = arith.constant 0 : index
    %35 = vector.load %arg7[%c0_18, %c0_19] : memref<1x512xf32, #tpu.memory_space<vmem>>, vector<1x512xf32>
    %36 = vector.broadcast %35 : vector<1x512xf32> to vector<16x512xf32>
    %37 = arith.addf %34, %36 : vector<16x512xf32>
    %cst_20 = arith.constant dense<0.000000e+00> : vector<512xf32>
    %38 = vector.multi_reduction <add>, %37, %cst_20 [0] : vector<16x512xf32> to vector<512xf32>
    %39 = vector.shape_cast %38 : vector<512xf32> to vector<1x512xf32>
    %cst_21 = arith.constant 1.600000e+01 : f32
    %40 = vector.broadcast %cst_21 : f32 to vector<1x512xf32>
    %41 = arith.divf %39, %40 : vector<1x512xf32>
    %42 = arith.mulf %37, %37 : vector<16x512xf32>
    %cst_22 = arith.constant dense<0.000000e+00> : vector<512xf32>
    %43 = vector.multi_reduction <add>, %42, %cst_22 [0] : vector<16x512xf32> to vector<512xf32>
    %44 = vector.shape_cast %43 : vector<512xf32> to vector<1x512xf32>
    %cst_23 = arith.constant 1.600000e+01 : f32
    %45 = vector.broadcast %cst_23 : f32 to vector<1x512xf32>
    %46 = arith.divf %44, %45 : vector<1x512xf32>
    %47 = arith.mulf %41, %41 : vector<1x512xf32>
    %48 = arith.subf %46, %47 : vector<1x512xf32>
    %c0_24 = arith.constant 0 : index
    %c0_25 = arith.constant 0 : index
    %49 = vector.load %arg8[%c0_24, %c0_25] : memref<1x512xf32, #tpu.memory_space<vmem>>, vector<1x512xf32>
    %cst_26 = arith.constant 9.99999974E-6 : f32
    %50 = vector.broadcast %cst_26 : f32 to vector<1x512xf32>
    %51 = arith.addf %48, %50 : vector<1x512xf32>
    %52 = math.rsqrt %51 : vector<1x512xf32>
    %53 = arith.mulf %49, %52 : vector<1x512xf32>
    %c0_27 = arith.constant 0 : index
    %c0_28 = arith.constant 0 : index
    %54 = vector.load %arg9[%c0_27, %c0_28] : memref<1x512xf32, #tpu.memory_space<vmem>>, vector<1x512xf32>
    %55 = arith.mulf %41, %53 : vector<1x512xf32>
    %56 = arith.subf %54, %55 : vector<1x512xf32>
    %57 = vector.broadcast %53 : vector<1x512xf32> to vector<16x512xf32>
    %58 = arith.mulf %37, %57 : vector<16x512xf32>
    %59 = vector.broadcast %56 : vector<1x512xf32> to vector<16x512xf32>
    %60 = arith.addf %58, %59 : vector<16x512xf32>
    %cst_29 = arith.constant 0.000000e+00 : f32
    %61 = vector.broadcast %cst_29 : f32 to vector<16x512xf32>
    %62 = arith.maximumf %60, %61 : vector<16x512xf32>
    %63 = arith.truncf %62 : vector<16x512xf32> to vector<16x512xbf16>
    %c0_30 = arith.constant 0 : index
    %c0_31 = arith.constant 0 : index
    %64 = vector.load %arg10[%c0_30, %c0_31] : memref<512x256xbf16, #tpu.memory_space<vmem>>, vector<512x256xbf16>
    %cst_32 = arith.constant dense<0.000000e+00> : vector<16x256xf32>
    %65 = tpu.matmul %63, %64, %cst_32 {dimension_numbers = #tpu.dot_dimension_numbers<[1], [0], [0], [1], [0, 0, 1, 1], [], []>} : vector<16x512xbf16>, vector<512x256xbf16>, vector<16x256xf32> -> vector<16x256xf32>
    %c0_33 = arith.constant 0 : index
    %c0_34 = arith.constant 0 : index
    %66 = vector.load %arg11[%c0_33, %c0_34] : memref<1x256xf32, #tpu.memory_space<vmem>>, vector<1x256xf32>
    %67 = vector.broadcast %66 : vector<1x256xf32> to vector<16x256xf32>
    %68 = arith.addf %65, %67 : vector<16x256xf32>
    %cst_35 = arith.constant dense<0.000000e+00> : vector<256xf32>
    %69 = vector.multi_reduction <add>, %68, %cst_35 [0] : vector<16x256xf32> to vector<256xf32>
    %70 = vector.shape_cast %69 : vector<256xf32> to vector<1x256xf32>
    %cst_36 = arith.constant 1.600000e+01 : f32
    %71 = vector.broadcast %cst_36 : f32 to vector<1x256xf32>
    %72 = arith.divf %70, %71 : vector<1x256xf32>
    %73 = arith.mulf %68, %68 : vector<16x256xf32>
    %cst_37 = arith.constant dense<0.000000e+00> : vector<256xf32>
    %74 = vector.multi_reduction <add>, %73, %cst_37 [0] : vector<16x256xf32> to vector<256xf32>
    %75 = vector.shape_cast %74 : vector<256xf32> to vector<1x256xf32>
    %cst_38 = arith.constant 1.600000e+01 : f32
    %76 = vector.broadcast %cst_38 : f32 to vector<1x256xf32>
    %77 = arith.divf %75, %76 : vector<1x256xf32>
    %78 = arith.mulf %72, %72 : vector<1x256xf32>
    %79 = arith.subf %77, %78 : vector<1x256xf32>
    %c0_39 = arith.constant 0 : index
    %c0_40 = arith.constant 0 : index
    %80 = vector.load %arg12[%c0_39, %c0_40] : memref<1x256xf32, #tpu.memory_space<vmem>>, vector<1x256xf32>
    %cst_41 = arith.constant 9.99999974E-6 : f32
    %81 = vector.broadcast %cst_41 : f32 to vector<1x256xf32>
    %82 = arith.addf %79, %81 : vector<1x256xf32>
    %83 = math.rsqrt %82 : vector<1x256xf32>
    %84 = arith.mulf %80, %83 : vector<1x256xf32>
    %c0_42 = arith.constant 0 : index
    %c0_43 = arith.constant 0 : index
    %85 = vector.load %arg13[%c0_42, %c0_43] : memref<1x256xf32, #tpu.memory_space<vmem>>, vector<1x256xf32>
    %86 = arith.mulf %72, %84 : vector<1x256xf32>
    %87 = arith.subf %85, %86 : vector<1x256xf32>
    %88 = vector.broadcast %84 : vector<1x256xf32> to vector<16x256xf32>
    %89 = arith.mulf %68, %88 : vector<16x256xf32>
    %90 = vector.broadcast %87 : vector<1x256xf32> to vector<16x256xf32>
    %91 = arith.addf %89, %90 : vector<16x256xf32>
    %cst_44 = arith.constant 0.000000e+00 : f32
    %92 = vector.broadcast %cst_44 : f32 to vector<16x256xf32>
    %93 = arith.maximumf %91, %92 : vector<16x256xf32>
    %94 = arith.truncf %93 : vector<16x256xf32> to vector<16x256xbf16>
    %c0_45 = arith.constant 0 : index
    %c0_46 = arith.constant 0 : index
    %95 = vector.load %arg14[%c0_45, %c0_46] : memref<256x256xbf16, #tpu.memory_space<vmem>>, vector<256x256xbf16>
    %cst_47 = arith.constant dense<0.000000e+00> : vector<16x256xf32>
    %96 = tpu.matmul %94, %95, %cst_47 {dimension_numbers = #tpu.dot_dimension_numbers<[1], [0], [0], [1], [0, 0, 1, 1], [], []>} : vector<16x256xbf16>, vector<256x256xbf16>, vector<16x256xf32> -> vector<16x256xf32>
    %c0_48 = arith.constant 0 : index
    %c0_49 = arith.constant 0 : index
    %97 = vector.load %arg15[%c0_48, %c0_49] : memref<1x256xf32, #tpu.memory_space<vmem>>, vector<1x256xf32>
    %98 = vector.broadcast %97 : vector<1x256xf32> to vector<16x256xf32>
    %99 = arith.addf %96, %98 : vector<16x256xf32>
    %100 = vector.extract_strided_slice %99 {offsets = [0, 0], sizes = [16, 128], strides = [1, 1]} : vector<16x256xf32> to vector<16x128xf32>
    %101 = vector.extract_strided_slice %99 {offsets = [0, 128], sizes = [16, 128], strides = [1, 1]} : vector<16x256xf32> to vector<16x128xf32>
    %cst_50 = arith.constant 5.000000e-01 : f32
    %102 = vector.broadcast %cst_50 : f32 to vector<16x128xf32>
    %103 = arith.mulf %102, %101 : vector<16x128xf32>
    %104 = math.exp %103 : vector<16x128xf32>
    %c0_51 = arith.constant 0 : index
    %c0_52 = arith.constant 0 : index
    %105 = vector.load %arg1[%c0_51, %c0_52] : memref<16x128xf32, #tpu.memory_space<vmem>>, vector<16x128xf32>
    %106 = arith.mulf %105, %104 : vector<16x128xf32>
    %107 = arith.addf %100, %106 : vector<16x128xf32>
    %108 = arith.truncf %107 : vector<16x128xf32> to vector<16x128xbf16>
    %c0_53 = arith.constant 0 : index
    %c0_54 = arith.constant 0 : index
    %109 = vector.load %arg16[%c0_53, %c0_54] : memref<128x256xbf16, #tpu.memory_space<vmem>>, vector<128x256xbf16>
    %cst_55 = arith.constant dense<0.000000e+00> : vector<16x256xf32>
    %110 = tpu.matmul %108, %109, %cst_55 {dimension_numbers = #tpu.dot_dimension_numbers<[1], [0], [0], [1], [0, 0, 1, 1], [], []>} : vector<16x128xbf16>, vector<128x256xbf16>, vector<16x256xf32> -> vector<16x256xf32>
    %c0_56 = arith.constant 0 : index
    %c0_57 = arith.constant 0 : index
    %111 = vector.load %arg17[%c0_56, %c0_57] : memref<1x256xf32, #tpu.memory_space<vmem>>, vector<1x256xf32>
    %112 = vector.broadcast %111 : vector<1x256xf32> to vector<16x256xf32>
    %113 = arith.addf %110, %112 : vector<16x256xf32>
    %cst_58 = arith.constant 0.000000e+00 : f32
    %114 = vector.broadcast %cst_58 : f32 to vector<16x256xf32>
    %115 = arith.maximumf %113, %114 : vector<16x256xf32>
    %116 = arith.truncf %115 : vector<16x256xf32> to vector<16x256xbf16>
    %c0_59 = arith.constant 0 : index
    %c0_60 = arith.constant 0 : index
    %117 = vector.load %arg18[%c0_59, %c0_60] : memref<256x512xbf16, #tpu.memory_space<vmem>>, vector<256x512xbf16>
    %cst_61 = arith.constant dense<0.000000e+00> : vector<16x512xf32>
    %118 = tpu.matmul %116, %117, %cst_61 {dimension_numbers = #tpu.dot_dimension_numbers<[1], [0], [0], [1], [0, 0, 1, 1], [], []>} : vector<16x256xbf16>, vector<256x512xbf16>, vector<16x512xf32> -> vector<16x512xf32>
    %c0_62 = arith.constant 0 : index
    %c0_63 = arith.constant 0 : index
    %119 = vector.load %arg19[%c0_62, %c0_63] : memref<1x512xf32, #tpu.memory_space<vmem>>, vector<1x512xf32>
    %120 = vector.broadcast %119 : vector<1x512xf32> to vector<16x512xf32>
    %121 = arith.addf %118, %120 : vector<16x512xf32>
    %cst_64 = arith.constant 0.000000e+00 : f32
    %122 = vector.broadcast %cst_64 : f32 to vector<16x512xf32>
    %123 = arith.maximumf %121, %122 : vector<16x512xf32>
    %124 = arith.truncf %123 : vector<16x512xf32> to vector<16x512xbf16>
    %c0_65 = arith.constant 0 : index
    %c0_66 = arith.constant 0 : index
    %125 = vector.load %arg20[%c0_65, %c0_66] : memref<512x256xbf16, #tpu.memory_space<vmem>>, vector<512x256xbf16>
    %cst_67 = arith.constant dense<0.000000e+00> : vector<16x256xf32>
    %126 = tpu.matmul %124, %125, %cst_67 {dimension_numbers = #tpu.dot_dimension_numbers<[1], [0], [0], [1], [0, 0, 1, 1], [], []>} : vector<16x512xbf16>, vector<512x256xbf16>, vector<16x256xf32> -> vector<16x256xf32>
    %c0_68 = arith.constant 0 : index
    %c0_69 = arith.constant 0 : index
    %127 = vector.load %arg21[%c0_68, %c0_69] : memref<1x256xf32, #tpu.memory_space<vmem>>, vector<1x256xf32>
    %128 = vector.broadcast %127 : vector<1x256xf32> to vector<16x256xf32>
    %129 = arith.addf %126, %128 : vector<16x256xf32>
    %cst_70 = arith.constant 0.000000e+00 : f32
    %130 = vector.broadcast %cst_70 : f32 to vector<16x256xf32>
    %131 = arith.maximumf %129, %130 : vector<16x256xf32>
    %132 = arith.truncf %131 : vector<16x256xf32> to vector<16x256xbf16>
    %c0_71 = arith.constant 0 : index
    %c0_72 = arith.constant 0 : index
    %133 = vector.load %arg22[%c0_71, %c0_72] : memref<256x128xbf16, #tpu.memory_space<vmem>>, vector<256x128xbf16>
    %cst_73 = arith.constant dense<0.000000e+00> : vector<16x128xf32>
    %134 = tpu.matmul %132, %133, %cst_73 {dimension_numbers = #tpu.dot_dimension_numbers<[1], [0], [0], [1], [0, 0, 1, 1], [], []>} : vector<16x256xbf16>, vector<256x128xbf16>, vector<16x128xf32> -> vector<16x128xf32>
    %c0_74 = arith.constant 0 : index
    %c0_75 = arith.constant 0 : index
    %135 = vector.load %arg23[%c0_74, %c0_75] : memref<1x128xf32, #tpu.memory_space<vmem>>, vector<1x128xf32>
    %136 = vector.broadcast %135 : vector<1x128xf32> to vector<16x128xf32>
    %137 = arith.addf %134, %136 : vector<16x128xf32>
    %138 = arith.negf %137 : vector<16x128xf32>
    %139 = math.exp %138 : vector<16x128xf32>
    %cst_76 = arith.constant 1.000000e+00 : f32
    %140 = vector.broadcast %cst_76 : f32 to vector<16x128xf32>
    %141 = arith.addf %140, %139 : vector<16x128xf32>
    %142 = arith.divf %140, %141 : vector<16x128xf32>
    %c0_77 = arith.constant 0 : index
    %c0_78 = arith.constant 0 : index
    %143 = vector.load %arg24[%c0_77, %c0_78] : memref<16x128xf32, #tpu.memory_space<vmem>>, vector<16x128xf32>
    tpu.vector_store %arg24[%c0_77, %c0_78], %142 {strides = array<i32>} : memref<16x128xf32, #tpu.memory_space<vmem>>, vector<16x128xf32>,
    %c0_79 = arith.constant 0 : index
    %c0_80 = arith.constant 0 : index
    %144 = vector.load %arg25[%c0_79, %c0_80] : memref<16x128xf32, #tpu.memory_space<vmem>>, vector<16x128xf32>
    tpu.vector_store %arg25[%c0_79, %c0_80], %100 {strides = array<i32>} : memref<16x128xf32, #tpu.memory_space<vmem>>, vector<16x128xf32>,
    %c0_81 = arith.constant 0 : index
    %c0_82 = arith.constant 0 : index
    %145 = vector.load %arg26[%c0_81, %c0_82] : memref<16x128xf32, #tpu.memory_space<vmem>>, vector<16x128xf32>
    tpu.vector_store %arg26[%c0_81, %c0_82], %101 {strides = array<i32>} : memref<16x128xf32, #tpu.memory_space<vmem>>, vector<16x128xf32>,
    return
  }
}

</mosaic_0001>

<bundles_post_ra>
// kernel: vae_forward.1
= control target key start
LH: loop header
LB: loop body
LE: loop exit
PB: predicated region body
PF: predicated region fallthrough
CT: control target
= control target key end

     0   :  { %s5635_s0 = inlined_call_operand.vmem [shape: f32[16,128], index: 0, kind: input, shape index: {}]   ;;  %s5636_s1 = inlined_call_operand.vmem [shape: f32[16,128], index: 1, kind: input, shape index: {}]   ;;  %s5637_s2 = inlined_call_operand.hbm [shape: bf16[128,256], index: 2, kind: input, shape index: {}]   ;;  %s5638_s3 = inlined_call_operand.hbm [shape: f32[1,256], index: 3, kind: input, shape index: {}]   ;;  %s5639_s4 = inlined_call_operand.hbm [shape: f32[1,256], index: 4, kind: input, shape index: {}]   ;;  %s5640_s5 = inlined_call_operand.hbm [shape: f32[1,256], index: 5, kind: input, shape index: {}]   ;;  %s5641_s6 = inlined_call_operand.hbm [shape: bf16[256,512], index: 6, kind: input, shape index: {}]   ;;  %s5642_s7 = inlined_call_operand.vmem [shape: f32[1,512], index: 7, kind: input, shape index: {}]   ;;  %s5643_s8 = inlined_call_operand.vmem [shape: f32[1,512], index: 8, kind: input, shape index: {}]   ;;  %s5644_s9 = inlined_call_operand.hbm [shape: f32[1,512], index: 9, kind: input, shape index: {}]   ;;  %s5645_s10 = inlined_call_operand.hbm [shape: bf16[512,256], index: 10, kind: input, shape index: {}]   ;;  %s5646_s11 = inlined_call_operand.hbm [shape: f32[1,256], index: 11, kind: input, shape index: {}]   ;;  %s5647_s12 = inlined_call_operand.hbm [shape: f32[1,256], index: 12, kind: input, shape index: {}]   ;;  %s5648_s13 = inlined_call_operand.hbm [shape: f32[1,256], index: 13, kind: input, shape index: {}]   ;;  %s5649_s14 = inlined_call_operand.hbm [shape: bf16[256,256], index: 14, kind: input, shape index: {}]   ;;  %s5650_s15 = inlined_call_operand.hbm [shape: f32[1,256], index: 15, kind: input, shape index: {}]   ;;  %s5651_s16 = inlined_call_operand.vmem [shape: bf16[128,256], index: 16, kind: input, shape index: {}]   ;;  %s5652_s17 = inlined_call_operand.hbm [shape: f32[1,256], index: 17, kind: input, shape index: {}]   ;;  %s5653_s18 = inlined_call_operand.hbm [shape: bf16[256,512], index: 18, kind: input, shape index: {}]   ;;  %s5654_s19 = inlined_call_operand.hbm [shape: f32[1,512], index: 19, kind: input, shape index: {}]   ;;  %s5655_s20 = inlined_call_operand.hbm [shape: bf16[512,256], index: 20, kind: input, shape index: {}]   ;;  %s5656_s21 = inlined_call_operand.hbm [shape: f32[1,256], index: 21, kind: input, shape index: {}]   ;;  %s5657_s22 = inlined_call_operand.hbm [shape: bf16[256,128], index: 22, kind: input, shape index: {}]   ;;  %s5658_s23 = inlined_call_operand.vmem [shape: f32[1,128], index: 23, kind: input, shape index: {}]   ;;  %s5659_s24 = inlined_call_operand.hbm [shape: f32[16,128], index: 24, kind: output, shape index: {0}]   ;;  %s5660_s25 = inlined_call_operand.hbm [shape: f32[16,128], index: 25, kind: output, shape index: {1}]   ;;  %s5661_s26 = inlined_call_operand.hbm [shape: f32[16,128], index: 26, kind: output, shape index: {2}]  }
   0x1   :  { %5672 = sst [smem:[#allocation47_spill]] %s5635_s0 }
   0x2   :  { %5673 = sst [smem:[#allocation48_spill]] %s5636_s1 }
   0x3   :  { %5674 = sst [smem:[#allocation49_spill]] %s5637_s2 }
   0x4   :  { %5675 = sst [smem:[#allocation50_spill]] %s5638_s3 }
   0x5   :  { %5676 = sst [smem:[#allocation51_spill]] %s5639_s4 }
   0x6   :  { %5677 = sst [smem:[#allocation52_spill]] %s5640_s5 }
   0x7   :  { %5678 = sst [smem:[#allocation53_spill]] %s5641_s6 }
   0x8   :  { %5679 = sst [smem:[#allocation54_spill]] %s5642_s7 }
   0x9   :  { %5680 = sst [smem:[#allocation55_spill]] %s5643_s8 }
   0xa   :  { %5681 = sst [smem:[#allocation56_spill]] %s5644_s9 }
   0xb   :  { %5682 = sst [smem:[#allocation57_spill]] %s5645_s10 }
   0xc   :  { %5683 = sst [smem:[#allocation58_spill]] %s5659_s24 }
   0xd   :  { %32 = vsyncpa [#allocation3], 0 }
   0xe   :  { %33 = vsyncpa [#allocation6], 0 }
   0xf   :  { %34 = vsyncpa [#allocation9], 0 }
  0x10   :  { %35 = vsyncpa [#allocation12], 0 }
  0x11   :  { %36 = vsyncpa [#allocation15], 0 }
  0x12   :  { %37 = vsyncpa [#allocation18], 0 }
  0x13   :  { %38 = vsyncpa [#allocation21], 0 }
  0x14   :  { %39 = vsyncpa [#allocation24], 0 }
  0x15   :  { %40 = vsyncpa [#allocation27], 0 }
  0x16   :  { %41 = vsyncpa [#allocation30], 0 }
  0x17   :  { %42 = vsyncpa [#allocation4], 0 }
  0x18   :  { %43 = vsyncpa [#allocation33], 0  ;;  %s4978_s27 = smov [#allocation5]   ;;  %s4979_s7 = smov [#allocation8]  }
  0x19   :  { %s66_s3 = sshll.u32 %s4978_s27, 4  ;;  %s86_s28 = sshll.u32 %s4979_s7, 4  ;;  %s67_s3 = int_to_ptr.vmem [resolvable:$true] %s66_s3  ;;  %s87_s28 = int_to_ptr.vmem [resolvable:$true] %s86_s28 }
  0x1a   :  { %s5684_s29 = sld [smem:[#allocation50_spill]] }
  0x20   :  { %s4492_s0 = scalar_lea.hbm %s5684_s29, 32 }
  0x21   :  { %p4493_p0 = scmp.ne.s32.totalorder %s5684_s29, %s4492_s0  ;;  %p4496_p1 = scmp.lt.u32.totalorder %s4492_s0, %s5684_s29 }
  0x23   :  { %p4498_p2 = pnand %p4496_p1, %p4493_p0 }
  0x25   :  { %4501 = shalt.err (!%p4498_p2)
}
  0x26   :  { %s4502_s10 = scalar_lea.vmem %s67_s3, 32  ;;  %p4507_p4 = scmp.lt.s32.totalorder %s67_s3, %s67_s3 }
  0x27   :  { %p4503_p3 = scmp.ne.s32.totalorder %s67_s3, %s4502_s10  ;;  %p4508_p5 = scmp.lt.s32.totalorder %s4502_s10, %s4502_s10 }
  0x29   :  { %p4509_p6 = por %p4508_p5, %p4507_p4 }
  0x2b   :  { %p4510_p7 = pnand %p4509_p6, %p4503_p3 }
  0x2d   :  { %4513 = shalt.err (!%p4510_p7)
}
  0x2e   :  { %69 = dma.hbm_to_vmem [thread:$0]  %s5684_s29, 32, %s67_s3, [#allocation6]  }
  0x2f   :  { %s5685_s8 = sld [smem:[#allocation52_spill]] }
  0x35   :  { %s4514_s4 = scalar_lea.hbm %s5685_s8, 32 }
  0x36   :  { %p4515_p8 = scmp.ne.s32.totalorder %s5685_s8, %s4514_s4  ;;  %p4518_p9 = scmp.lt.u32.totalorder %s4514_s4, %s5685_s8 }
  0x38   :  { %p4520_p10 = pnand %p4518_p9, %p4515_p8 }
  0x3a   :  { %4523 = shalt.err (!%p4520_p10)
}
  0x3b   :  { %s4524_s5 = scalar_lea.vmem %s87_s28, 32  ;;  %p4529_p12 = scmp.lt.s32.totalorder %s87_s28, %s87_s28 }
  0x3c   :  { %p4525_p11 = scmp.ne.s32.totalorder %s87_s28, %s4524_s5  ;;  %p4530_p13 = scmp.lt.s32.totalorder %s4524_s5, %s4524_s5 }
  0x3e   :  { %p4531_p0 = por %p4530_p13, %p4529_p12 }
  0x40   :  { %p4532_p1 = pnand %p4531_p0, %p4525_p11 }
  0x42   :  { %4535 = shalt.err (!%p4532_p1)
}
  0x43   :  { %89 = dma.hbm_to_vmem [thread:$0]  %s5685_s8, 32, %s87_s28, [#allocation9]  }
  0x44   :  { %s4980_s10 = smov [#allocation11]   ;;  %s4981_s1 = smov [#allocation14]  }
  0x45   :  { %s112_s6 = sshll.u32 %s4980_s10, 4  ;;  %s134_s27 = sshll.u32 %s4981_s1, 4  ;;  %s113_s6 = int_to_ptr.vmem [resolvable:$true] %s112_s6  ;;  %s135_s27 = int_to_ptr.vmem [resolvable:$true] %s134_s27 }
  0x46   :  { %s5686_s9 = sld [smem:[#allocation56_spill]] }
  0x4c   :  { %s4536_s30 = scalar_lea.hbm %s5686_s9, 64 }
  0x4d   :  { %p4537_p2 = scmp.ne.s32.totalorder %s5686_s9, %s4536_s30  ;;  %p4540_p3 = scmp.lt.u32.totalorder %s4536_s30, %s5686_s9 }
  0x4f   :  { %p4542_p4 = pnand %p4540_p3, %p4537_p2 }
  0x51   :  { %4545 = shalt.err (!%p4542_p4)
}
  0x52   :  { %s4546_s28 = scalar_lea.vmem %s113_s6, 64  ;;  %p4551_p6 = scmp.lt.s32.totalorder %s113_s6, %s113_s6 }
  0x53   :  { %p4547_p5 = scmp.ne.s32.totalorder %s113_s6, %s4546_s28  ;;  %p4552_p7 = scmp.lt.s32.totalorder %s4546_s28, %s4546_s28 }
  0x55   :  { %p4553_p8 = por %p4552_p7, %p4551_p6 }
  0x57   :  { %p4554_p9 = pnand %p4553_p8, %p4547_p5 }
  0x59   :  { %4557 = shalt.err (!%p4554_p9)
}
  0x5a   :  { %115 = dma.hbm_to_vmem [thread:$0]  %s5686_s9, 64, %s113_s6, [#allocation12]  }
  0x5b   :  { %s4558_s1 = scalar_lea.hbm %s5646_s11, 32 }
  0x5c   :  { %p4559_p10 = scmp.ne.s32.totalorder %s5646_s11, %s4558_s1  ;;  %p4562_p11 = scmp.lt.u32.totalorder %s4558_s1, %s5646_s11 }
  0x5e   :  { %p4564_p12 = pnand %p4562_p11, %p4559_p10 }
  0x60   :  { %4567 = shalt.err (!%p4564_p12)
}
  0x61   :  { %s4568_s0 = scalar_lea.vmem %s135_s27, 32  ;;  %p4573_p0 = scmp.lt.s32.totalorder %s135_s27, %s135_s27 }
  0x62   :  { %p4569_p13 = scmp.ne.s32.totalorder %s135_s27, %s4568_s0  ;;  %p4574_p1 = scmp.lt.s32.totalorder %s4568_s0, %s4568_s0 }
  0x64   :  { %p4575_p2 = por %p4574_p1, %p4573_p0 }
  0x66   :  { %p4576_p3 = pnand %p4575_p2, %p4569_p13 }
  0x68   :  { %4579 = shalt.err (!%p4576_p3)
}
  0x69   :  { %137 = dma.hbm_to_vmem [thread:$0]  %s5646_s11, 32, %s135_s27, [#allocation15]  }
  0x6a   :  { %s4982_s2 = smov [#allocation17]   ;;  %s4983_s28 = smov [#allocation20]  }
  0x6b   :  { %s154_s5 = sshll.u32 %s4982_s2, 4  ;;  %s176_s8 = sshll.u32 %s4983_s28, 4  ;;  %s155_s5 = int_to_ptr.vmem [resolvable:$true] %s154_s5  ;;  %s177_s8 = int_to_ptr.vmem [resolvable:$true] %s176_s8 }
  0x6c   :  { %s4580_s10 = scalar_lea.hbm %s5648_s13, 32 }
  0x6d   :  { %p4581_p4 = scmp.ne.s32.totalorder %s5648_s13, %s4580_s10  ;;  %p4584_p5 = scmp.lt.u32.totalorder %s4580_s10, %s5648_s13 }
  0x6f   :  { %p4586_p6 = pnand %p4584_p5, %p4581_p4 }
  0x71   :  { %4589 = shalt.err (!%p4586_p6)
}
  0x72   :  { %s4590_s11 = scalar_lea.vmem %s155_s5, 32  ;;  %p4595_p8 = scmp.lt.s32.totalorder %s155_s5, %s155_s5 }
  0x73   :  { %p4591_p7 = scmp.ne.s32.totalorder %s155_s5, %s4590_s11  ;;  %p4596_p9 = scmp.lt.s32.totalorder %s4590_s11, %s4590_s11 }
  0x75   :  { %p4597_p10 = por %p4596_p9, %p4595_p8 }
  0x77   :  { %p4598_p11 = pnand %p4597_p10, %p4591_p7 }
  0x79   :  { %4601 = shalt.err (!%p4598_p11)
}
  0x7a   :  { %157 = dma.hbm_to_vmem [thread:$0]  %s5648_s13, 32, %s155_s5, [#allocation18]  }
  0x7b   :  { %s4602_s9 = scalar_lea.hbm %s5650_s15, 32 }
  0x7c   :  { %p4603_p12 = scmp.ne.s32.totalorder %s5650_s15, %s4602_s9  ;;  %p4606_p13 = scmp.lt.u32.totalorder %s4602_s9, %s5650_s15 }
  0x7e   :  { %p4608_p0 = pnand %p4606_p13, %p4603_p12 }
  0x80   :  { %4611 = shalt.err (!%p4608_p0)
}
  0x81   :  { %s4612_s10 = scalar_lea.vmem %s177_s8, 32  ;;  %p4617_p2 = scmp.lt.s32.totalorder %s177_s8, %s177_s8 }
  0x82   :  { %p4613_p1 = scmp.ne.s32.totalorder %s177_s8, %s4612_s10  ;;  %p4618_p3 = scmp.lt.s32.totalorder %s4612_s10, %s4612_s10 }
  0x84   :  { %p4619_p4 = por %p4618_p3, %p4617_p2 }
  0x86   :  { %p4620_p5 = pnand %p4619_p4, %p4613_p1 }
  0x88   :  { %4623 = shalt.err (!%p4620_p5)
}
  0x89   :  { %179 = dma.hbm_to_vmem [thread:$0]  %s5650_s15, 32, %s177_s8, [#allocation21]  }
  0x8a   :  { %s4984_s1 = smov [#allocation23]   ;;  %s4624_s11 = scalar_lea.hbm %s5653_s18, 8192 }
  0x8b   :  { %s197_s7 = sshll.u32 %s4984_s1, 4  ;;  %p4625_p6 = scmp.ne.s32.totalorder %s5653_s18, %s4624_s11  ;;  %s198_s7 = int_to_ptr.vmem [resolvable:$true] %s197_s7 }
  0x8c   :  { %p4628_p7 = scmp.lt.u32.totalorder %s4624_s11, %s5653_s18 }
  0x8e   :  { %p4630_p8 = pnand %p4628_p7, %p4625_p6 }
  0x90   :  { %4633 = shalt.err (!%p4630_p8)
}
  0x91   :  { %s4634_s9 = scalar_lea.vmem %s198_s7, 8192  ;;  %p4639_p10 = scmp.lt.s32.totalorder %s198_s7, %s198_s7 }
  0x92   :  { %p4635_p9 = scmp.ne.s32.totalorder %s198_s7, %s4634_s9  ;;  %p4640_p11 = scmp.lt.s32.totalorder %s4634_s9, %s4634_s9 }
  0x94   :  { %p4641_p12 = por %p4640_p11, %p4639_p10 }
  0x96   :  { %p4642_p13 = pnand %p4641_p12, %p4635_p9 }
  0x98   :  { %4645 = shalt.err (!%p4642_p13)
}
  0x99   :  { %s4985_s15 = smov 256   ;;  %s4986_s8 = smov 16  }
  0x9a   :  { %203 = dma.hbm_to_vmem [thread:$0]  %s5653_s18, 8192, %s198_s7, [#allocation24], %s4985_s15, %s4985_s15, %s4986_s8  }
  0x9b   :  { %s4987_s3 = smov [#allocation26]   ;;  %s4988_s10 = smov [#allocation2]  }
  0x9c   :  { %s219_s29 = sshll.u32 %s4987_s3, 4  ;;  %s53_s13 = sshll.u32 %s4988_s10, 4  ;;  %s220_s29 = int_to_ptr.vmem [resolvable:$true] %s219_s29  ;;  %s54_s13 = int_to_ptr.vmem [resolvable:$true] %s53_s13 }
  0x9d   :  { %s4646_s24 = scalar_lea.hbm %s5655_s20, 8192 }
  0x9e   :  { %p4647_p0 = scmp.ne.s32.totalorder %s5655_s20, %s4646_s24  ;;  %p4650_p1 = scmp.lt.u32.totalorder %s4646_s24, %s5655_s20 }
  0xa0   :  { %p4652_p2 = pnand %p4650_p1, %p4647_p0 }
  0xa2   :  { %4655 = shalt.err (!%p4652_p2)
}
  0xa3   :  { %s4656_s18 = scalar_lea.vmem %s220_s29, 8192  ;;  %p4661_p4 = scmp.lt.s32.totalorder %s220_s29, %s220_s29 }
  0xa4   :  { %p4657_p3 = scmp.ne.s32.totalorder %s220_s29, %s4656_s18  ;;  %p4662_p5 = scmp.lt.s32.totalorder %s4656_s18, %s4656_s18 }
  0xa6   :  { %p4663_p6 = por %p4662_p5, %p4661_p4 }
  0xa8   :  { %p4664_p7 = pnand %p4663_p6, %p4657_p3 }
  0xaa   :  { %4667 = shalt.err (!%p4664_p7)
}
  0xab   :  { %s4989_s7 = smov 128   ;;  %s4990_s0 = smov 8  }
  0xac   :  { %225 = dma.hbm_to_vmem [thread:$0]  %s5655_s20, 8192, %s220_s29, [#allocation27], %s4989_s7, %s4989_s7, %s4990_s0  }
  0xad   :  { %s5687_s3 = sld [smem:[#allocation49_spill]] }
  0xb3   :  { %s4668_s10 = scalar_lea.hbm %s5687_s3, 2048 }
  0xb4   :  { %p4669_p8 = scmp.ne.s32.totalorder %s5687_s3, %s4668_s10  ;;  %p4672_p9 = scmp.lt.u32.totalorder %s4668_s10, %s5687_s3 }
  0xb6   :  { %p4674_p10 = pnand %p4672_p9, %p4669_p8 }
  0xb8   :  { %4677 = shalt.err (!%p4674_p10)
}
  0xb9   :  { %s4678_s11 = scalar_lea.vmem %s54_s13, 2048  ;;  %p4683_p12 = scmp.lt.s32.totalorder %s54_s13, %s54_s13 }
  0xba   :  { %p4679_p11 = scmp.ne.s32.totalorder %s54_s13, %s4678_s11  ;;  %p4684_p13 = scmp.lt.s32.totalorder %s4678_s11, %s4678_s11 }
  0xbc   :  { %p4685_p0 = por %p4684_p13, %p4683_p12 }
  0xbe   :  { %p4686_p1 = pnand %p4685_p0, %p4679_p11 }
  0xc0   :  { %4689 = shalt.err (!%p4686_p1)
}
  0xc1   :  { %59 = dma.hbm_to_vmem [thread:$0]  %s5687_s3, 2048, %s54_s13, [#allocation3], %s4989_s7, %s4989_s7, %s4990_s0  }
  0xc2   :  { %s4991_s27 = smov [#allocation7]   ;;  %s4992_s18 = smov [#allocation10]  }
  0xc3   :  { %s76_s30 = sshll.u32 %s4991_s27, 4  ;;  %s95_s6 = sshll.u32 %s4992_s18, 4  ;;  %s77_s30 = int_to_ptr.vmem [resolvable:$true] %s76_s30  ;;  %s96_s6 = int_to_ptr.vmem [resolvable:$true] %s95_s6 }
  0xc4   :  { %s5688_s28 = sld [smem:[#allocation51_spill]] }
  0xca   :  { %s4690_s10 = scalar_lea.hbm %s5688_s28, 32 }
  0xcb   :  { %p4691_p2 = scmp.ne.s32.totalorder %s5688_s28, %s4690_s10  ;;  %p4694_p3 = scmp.lt.u32.totalorder %s4690_s10, %s5688_s28 }
  0xcd   :  { %p4696_p4 = pnand %p4694_p3, %p4691_p2 }
  0xcf   :  { %4699 = shalt.err (!%p4696_p4)
}
  0xd0   :  { %s4700_s13 = scalar_lea.vmem %s77_s30, 32  ;;  %p4705_p6 = scmp.lt.s32.totalorder %s77_s30, %s77_s30 }
  0xd1   :  { %p4701_p5 = scmp.ne.s32.totalorder %s77_s30, %s4700_s13  ;;  %p4706_p7 = scmp.lt.s32.totalorder %s4700_s13, %s4700_s13 }
  0xd3   :  { %p4707_p8 = por %p4706_p7, %p4705_p6 }
  0xd5   :  { %p4708_p9 = pnand %p4707_p8, %p4701_p5 }
  0xd7   :  { %4711 = shalt.err (!%p4708_p9)
}
  0xd8   :  { %79 = dma.hbm_to_vmem [thread:$0]  %s5688_s28, 32, %s77_s30, [#allocation6]  }
  0xd9   :  { %s5689_s27 = sld [smem:[#allocation53_spill]] }
  0xdf   :  { %s4712_s18 = scalar_lea.hbm %s5689_s27, 8192 }
  0xe0   :  { %p4713_p10 = scmp.ne.s32.totalorder %s5689_s27, %s4712_s18  ;;  %p4716_p11 = scmp.lt.u32.totalorder %s4712_s18, %s5689_s27 }
  0xe2   :  { %p4718_p12 = pnand %p4716_p11, %p4713_p10 }
  0xe4   :  { %4721 = shalt.err (!%p4718_p12)
}
  0xe5   :  { %s4722_s1 = scalar_lea.vmem %s96_s6, 8192  ;;  %p4727_p0 = scmp.lt.s32.totalorder %s96_s6, %s96_s6 }
  0xe6   :  { %p4723_p13 = scmp.ne.s32.totalorder %s96_s6, %s4722_s1  ;;  %p4728_p1 = scmp.lt.s32.totalorder %s4722_s1, %s4722_s1 }
  0xe8   :  { %p4729_p2 = por %p4728_p1, %p4727_p0 }
  0xea   :  { %p4730_p3 = pnand %p4729_p2, %p4723_p13 }
  0xec   :  { %4733 = shalt.err (!%p4730_p3)
}
  0xed   :  { %101 = dma.hbm_to_vmem [thread:$0]  %s5689_s27, 8192, %s96_s6, [#allocation9], %s4985_s15, %s4985_s15, %s4986_s8  }
  0xee   :  { %s4993_s24 = smov [#allocation13]   ;;  %s4994_s13 = smov [#allocation16]  }
  0xef   :  { %s121_s4 = sshll.u32 %s4993_s24, 4  ;;  %s144_s3 = sshll.u32 %s4994_s13, 4  ;;  %s122_s4 = int_to_ptr.vmem [resolvable:$true] %s121_s4  ;;  %s145_s3 = int_to_ptr.vmem [resolvable:$true] %s144_s3 }
  0xf0   :  { %s5690_s29 = sld [smem:[#allocation57_spill]] }
  0xf6   :  { %s4734_s18 = scalar_lea.hbm %s5690_s29, 8192 }
  0xf7   :  { %p4735_p4 = scmp.ne.s32.totalorder %s5690_s29, %s4734_s18  ;;  %p4738_p5 = scmp.lt.u32.totalorder %s4734_s18, %s5690_s29 }
  0xf9   :  { %p4740_p6 = pnand %p4738_p5, %p4735_p4 }
  0xfb   :  { %4743 = shalt.err (!%p4740_p6)
}
  0xfc   :  { %s4744_s15 = scalar_lea.vmem %s122_s4, 8192  ;;  %p4749_p8 = scmp.lt.s32.totalorder %s122_s4, %s122_s4 }
  0xfd   :  { %p4745_p7 = scmp.ne.s32.totalorder %s122_s4, %s4744_s15  ;;  %p4750_p9 = scmp.lt.s32.totalorder %s4744_s15, %s4744_s15 }
  0xff   :  { %p4751_p10 = por %p4750_p9, %p4749_p8 }
 0x101   :  { %p4752_p11 = pnand %p4751_p10, %p4745_p7 }
 0x103   :  { %4755 = shalt.err (!%p4752_p11)
}
 0x104   :  { %127 = dma.hbm_to_vmem [thread:$0]  %s5690_s29, 8192, %s122_s4, [#allocation12], %s4989_s7, %s4989_s7, %s4990_s0  }
 0x105   :  { %s4756_s30 = scalar_lea.hbm %s5647_s12, 32 }
 0x106   :  { %p4757_p12 = scmp.ne.s32.totalorder %s5647_s12, %s4756_s30  ;;  %p4760_p13 = scmp.lt.u32.totalorder %s4756_s30, %s5647_s12 }
 0x108   :  { %p4762_p0 = pnand %p4760_p13, %p4757_p12 }
 0x10a   :  { %4765 = shalt.err (!%p4762_p0)
}
 0x10b   :  { %s4766_s20 = scalar_lea.vmem %s145_s3, 32  ;;  %p4771_p2 = scmp.lt.s32.totalorder %s145_s3, %s145_s3 }
 0x10c   :  { %p4767_p1 = scmp.ne.s32.totalorder %s145_s3, %s4766_s20  ;;  %p4772_p3 = scmp.lt.s32.totalorder %s4766_s20, %s4766_s20 }
 0x10e   :  { %p4773_p4 = por %p4772_p3, %p4771_p2 }
 0x110   :  { %p4774_p5 = pnand %p4773_p4, %p4767_p1 }
 0x112   :  { %4777 = shalt.err (!%p4774_p5)
}
 0x113   :  { %147 = dma.hbm_to_vmem [thread:$0]  %s5647_s12, 32, %s145_s3, [#allocation15]  }
 0x114   :  { %s4995_s18 = smov [#allocation19]   ;;  %s4996_s2 = smov [#allocation22]  }
 0x115   :  { %s163_s9 = sshll.u32 %s4995_s18, 4  ;;  %s188_s10 = sshll.u32 %s4996_s2, 4  ;;  %s164_s9 = int_to_ptr.vmem [resolvable:$true] %s163_s9  ;;  %s189_s10 = int_to_ptr.vmem [resolvable:$true] %s188_s10 }
 0x116   :  { %s4778_s8 = scalar_lea.hbm %s5649_s14, 4096 }
 0x117   :  { %p4779_p6 = scmp.ne.s32.totalorder %s5649_s14, %s4778_s8  ;;  %p4782_p7 = scmp.lt.u32.totalorder %s4778_s8, %s5649_s14 }
 0x119   :  { %p4784_p8 = pnand %p4782_p7, %p4779_p6 }
 0x11b   :  { %4787 = shalt.err (!%p4784_p8)
}
 0x11c   :  { %s4788_s12 = scalar_lea.vmem %s164_s9, 4096  ;;  %p4793_p10 = scmp.lt.s32.totalorder %s164_s9, %s164_s9 }
 0x11d   :  { %p4789_p9 = scmp.ne.s32.totalorder %s164_s9, %s4788_s12  ;;  %p4794_p11 = scmp.lt.s32.totalorder %s4788_s12, %s4788_s12 }
 0x11f   :  { %p4795_p12 = por %p4794_p11, %p4793_p10 }
 0x121   :  { %p4796_p13 = pnand %p4795_p12, %p4789_p9 }
 0x123   :  { %4799 = shalt.err (!%p4796_p13)
}
 0x124   :  { %169 = dma.hbm_to_vmem [thread:$0]  %s5649_s14, 4096, %s164_s9, [#allocation18], %s4989_s7, %s4989_s7, %s4990_s0  }
 0x125   :  { %s4800_s11 = scalar_lea.hbm %s5652_s17, 32 }
 0x126   :  { %p4801_p0 = scmp.ne.s32.totalorder %s5652_s17, %s4800_s11  ;;  %p4804_p1 = scmp.lt.u32.totalorder %s4800_s11, %s5652_s17 }
 0x128   :  { %p4806_p2 = pnand %p4804_p1, %p4801_p0 }
 0x12a   :  { %4809 = shalt.err (!%p4806_p2)
}
 0x12b   :  { %s4810_s2 = scalar_lea.vmem %s189_s10, 32  ;;  %p4815_p4 = scmp.lt.s32.totalorder %s189_s10, %s189_s10 }
 0x12c   :  { %p4811_p3 = scmp.ne.s32.totalorder %s189_s10, %s4810_s2  ;;  %p4816_p5 = scmp.lt.s32.totalorder %s4810_s2, %s4810_s2 }
 0x12e   :  { %p4817_p6 = por %p4816_p5, %p4815_p4 }
 0x130   :  { %p4818_p7 = pnand %p4817_p6, %p4811_p3 }
 0x132   :  { %4821 = shalt.err (!%p4818_p7)
}
 0x133   :  { %191 = dma.hbm_to_vmem [thread:$0]  %s5652_s17, 32, %s189_s10, [#allocation21]  }
 0x134   :  { %s4997_s5 = smov [#allocation25]   ;;  %s4998_s8 = smov [#allocation28]  }
 0x135   :  { %s210_s15 = sshll.u32 %s4997_s5, 4  ;;  %s232_s6 = sshll.u32 %s4998_s8, 4  ;;  %s211_s15 = int_to_ptr.vmem [resolvable:$true] %s210_s15  ;;  %s233_s6 = int_to_ptr.vmem [resolvable:$true] %s232_s6 }
 0x136   :  { %s4822_s30 = scalar_lea.hbm %s5654_s19, 64 }
 0x137   :  { %p4823_p8 = scmp.ne.s32.totalorder %s5654_s19, %s4822_s30  ;;  %p4826_p9 = scmp.lt.u32.totalorder %s4822_s30, %s5654_s19 }
 0x139   :  { %p4828_p10 = pnand %p4826_p9, %p4823_p8 }
 0x13b   :  { %4831 = shalt.err (!%p4828_p10)
}
 0x13c   :  { %s4832_s17 = scalar_lea.vmem %s211_s15, 64  ;;  %p4837_p12 = scmp.lt.s32.totalorder %s211_s15, %s211_s15 }
 0x13d   :  { %p4833_p11 = scmp.ne.s32.totalorder %s211_s15, %s4832_s17  ;;  %p4838_p13 = scmp.lt.s32.totalorder %s4832_s17, %s4832_s17 }
 0x13f   :  { %p4839_p0 = por %p4838_p13, %p4837_p12 }
 0x141   :  { %p4840_p1 = pnand %p4839_p0, %p4833_p11 }
 0x143   :  { %4843 = shalt.err (!%p4840_p1)
}
 0x144   :  { %213 = dma.hbm_to_vmem [thread:$0]  %s5654_s19, 64, %s211_s15, [#allocation24]  }
 0x145   :  { %s4844_s4 = scalar_lea.hbm %s5656_s21, 32 }
 0x146   :  { %p4845_p2 = scmp.ne.s32.totalorder %s5656_s21, %s4844_s4  ;;  %p4848_p3 = scmp.lt.u32.totalorder %s4844_s4, %s5656_s21 }
 0x148   :  { %p4850_p4 = pnand %p4848_p3, %p4845_p2 }
 0x14a   :  { %4853 = shalt.err (!%p4850_p4)
}
 0x14b   :  { %s4854_s9 = scalar_lea.vmem %s233_s6, 32  ;;  %p4859_p6 = scmp.lt.s32.totalorder %s233_s6, %s233_s6 }
 0x14c   :  { %p4855_p5 = scmp.ne.s32.totalorder %s233_s6, %s4854_s9  ;;  %p4860_p7 = scmp.lt.s32.totalorder %s4854_s9, %s4854_s9 }
 0x14e   :  { %p4861_p8 = por %p4860_p7, %p4859_p6 }
 0x150   :  { %p4862_p9 = pnand %p4861_p8, %p4855_p5 }
 0x152   :  { %4865 = shalt.err (!%p4862_p9)
}
 0x153   :  { %235 = dma.hbm_to_vmem [thread:$0]  %s5656_s21, 32, %s233_s6, [#allocation27]  }
 0x154   :  { %s4999_s15 = smov [#allocation29]   ;;  %s4866_s30 = scalar_lea.hbm %s5657_s22, 2048 }
 0x155   :  { %s241_s8 = sshll.u32 %s4999_s15, 4  ;;  %p4867_p10 = scmp.ne.s32.totalorder %s5657_s22, %s4866_s30  ;;  %s242_s8 = int_to_ptr.vmem [resolvable:$true] %s241_s8 }
 0x156   :  { %p4870_p11 = scmp.lt.u32.totalorder %s4866_s30, %s5657_s22 }
 0x158   :  { %p4872_p12 = pnand %p4870_p11, %p4867_p10 }
 0x15a   :  { %4875 = shalt.err (!%p4872_p12)
}
 0x15b   :  { %s4876_s17 = scalar_lea.vmem %s242_s8, 2048  ;;  %p4881_p0 = scmp.lt.s32.totalorder %s242_s8, %s242_s8 }
 0x15c   :  { %p4877_p13 = scmp.ne.s32.totalorder %s242_s8, %s4876_s17  ;;  %p4882_p1 = scmp.lt.s32.totalorder %s4876_s17, %s4876_s17 }
 0x15e   :  { %p4883_p2 = por %p4882_p1, %p4881_p0 }
 0x160   :  { %p4884_p3 = pnand %p4883_p2, %p4877_p13 }
 0x162   :  { %4887 = shalt.err (!%p4884_p3)
}
 0x163   :  { %s5000_s21 = smov 64   ;;  %s5001_s6 = smov 4  }
 0x164   :  { %247 = dma.hbm_to_vmem [thread:$0]  %s5657_s22, 2048, %s242_s8, [#allocation30], %s5000_s21, %s5000_s21, %s5001_s6  }
 0x165   :  { %4954 = dma.done.wait [#allocation3], 2048  }
 0x166   :  { %4955 = vsyncadd [#allocation3], 4294965248 }
 0x167   :  { %4956 = dma.done.wait [#allocation6], 64  }
 0x168   :  { %4957 = vsyncadd [#allocation6], 4294967232 }
 0x169   :  { %4958 = dma.done.wait [#allocation9], 8224  }
 0x16a   :  { %4959 = vsyncadd [#allocation9], 4294959072 }
 0x16b   :  { %4960 = dma.done.wait [#allocation12], 8256  }
 0x16c   :  { %4961 = vsyncadd [#allocation12], 4294959040 }
 0x16d   :  { %4962 = dma.done.wait [#allocation15], 64  }
 0x16e   :  { %4963 = vsyncadd [#allocation15], 4294967232 }
 0x16f   :  { %4964 = dma.done.wait [#allocation18], 4128  }
 0x170   :  { %4965 = vsyncadd [#allocation18], 4294963168 }
 0x171   :  { %4966 = dma.done.wait [#allocation21], 64  }
 0x172   :  { %4967 = vsyncadd [#allocation21], 4294967232 }
 0x173   :  { %4968 = dma.done.wait [#allocation24], 8256  }
 0x174   :  { %4969 = vsyncadd [#allocation24], 4294959040 }
 0x175   :  { %4970 = dma.done.wait [#allocation27], 8224  }
 0x176   :  { %4971 = vsyncadd [#allocation27], 4294959072 }
 0x177   :  { %4972 = dma.done.wait [#allocation30], 2048  }
 0x178   :  { %4973 = vsyncadd [#allocation30], 4294965248  ;;  %v5002_v0 = vmov 0   ;;  %v3968_v1 = vld [vmem:[#allocation2 + $0x4] ss:$8 sps:$4 sm:$0xff]   ;;  %s5691_s20 = sld [smem:[#allocation47_spill]] }
 0x179   :  { %448 = vmatprep.mubr.bf16.mxu1 %v5002_v0  ;;  %v3970_v2 = vld [vmem:[#allocation2] ss:$8 sps:$4 sm:$0xff]   ;;  %416 = vmatprep.subr.bf16.mxu1 %v3968_v1  ;;  %v3971_v3 = vld [vmem:[#allocation2 + $0x14] ss:$8 sps:$4 sm:$0xff]   ;;  %v3973_v4 = vld [vmem:[#allocation2 + $0x10] ss:$8 sps:$4 sm:$0xff]  }
 0x17a   :  { %417 = vmatpush1.bf16.msra.mxu1 %v3970_v2  ;;  %v3974_v5 = vld [vmem:[#allocation2 + $0x24] ss:$8 sps:$4 sm:$0xff]   ;;  %v3976_v6 = vld [vmem:[#allocation2 + $0x20] ss:$8 sps:$4 sm:$0xff]   ;;  %v3977_v7 = vld [vmem:[#allocation2 + $0x34] ss:$8 sps:$4 sm:$0xff]  }
 0x17b   :  { %418 = vmatprep.subr.bf16.mxu1 %v3971_v3  ;;  %v3979_v8 = vld [vmem:[#allocation2 + $0x30] ss:$8 sps:$4 sm:$0xff]   ;;  %v3980_v9 = vld [vmem:[#allocation2 + $0x44] ss:$8 sps:$4 sm:$0xff]   ;;  %v3982_v10 = vld [vmem:[#allocation2 + $0x40] ss:$8 sps:$4 sm:$0xff]  }
 0x17c   :  { %v3983_v11 = vld [vmem:[#allocation2 + $0x54] ss:$8 sps:$4 sm:$0xff]   ;;  %v3985_v12 = vld [vmem:[#allocation2 + $0x50] ss:$8 sps:$4 sm:$0xff]   ;;  %v3986_v13 = vld [vmem:[#allocation2 + $0x64] ss:$8 sps:$4 sm:$0xff]  }
 0x17d   :  { %v3988_v14 = vld [vmem:[#allocation2 + $0x60] ss:$8 sps:$4 sm:$0xff]   ;;  %v3989_v15 = vld [vmem:[#allocation2 + $0x74] ss:$8 sps:$4 sm:$0xff]   ;;  %v3991_v16 = vld [vmem:[#allocation2 + $0x70] ss:$8 sps:$4 sm:$0xff]  }
 0x17e   :  { %419 = vmatpush1.bf16.msra.mxu1 %v3973_v4  ;;  %v305_v17 = vld [vmem:[%s5691_s20] sm:$0xff]  ;;  %v306_v18 = vld [vmem:[%s5691_s20 + $0x8] sm:$0xff]  ;;  %s5692_s14 = sld [smem:[#allocation54_spill]]  ;;  %s5693_s5 = sld [smem:[#allocation55_spill]] }
 0x17f   :  { %420 = vmatprep.subr.bf16.mxu1 %v3974_v5  ;;  %v307_v19 = vpack.c.bf16 %v306_v18, %v305_v17  ;;  %v3994_v20 = vld [vmem:[#allocation10 + $0x4] ss:$16 sps:$4 sm:$0xff]   ;;  %v3995_v21 = vld [vmem:[#allocation10 + $0xc] ss:$16 sps:$4 sm:$0xff]   ;;  %v3992_v22 = vld [vmem:[#allocation10] ss:$16 sps:$4 sm:$0xff]  }
 0x180   :  { %v3997_v23 = vld [vmem:[#allocation10 + $0x8] ss:$16 sps:$4 sm:$0xff]   ;;  %1031 = vmatprep.subr.bf16.mxu0 %v3995_v21  ;;  %v4000_v24 = vld [vmem:[#allocation10 + $0x24] ss:$16 sps:$4 sm:$0xff]   ;;  %v4001_v25 = vld [vmem:[#allocation10 + $0x2c] ss:$16 sps:$4 sm:$0xff]   ;;  %v326_v21 = vlaneseq }
 0x181   :  { %1032 = vmatpush1.bf16.msra.mxu0 %v3997_v23  ;;  %v3998_v26 = vld [vmem:[#allocation10 + $0x20] ss:$16 sps:$4 sm:$0xff]   ;;  %v4003_v27 = vld [vmem:[#allocation10 + $0x28] ss:$16 sps:$4 sm:$0xff]   ;;  %v4006_v28 = vld [vmem:[#allocation10 + $0x44] ss:$16 sps:$4 sm:$0xff]  }
 0x182   :  { %421 = vmatpush1.bf16.msra.mxu1 %v3976_v6  ;;  %1033 = vmatprep.subr.bf16.mxu0 %v4001_v25  ;;  %v4007_v29 = vld [vmem:[#allocation10 + $0x4c] ss:$16 sps:$4 sm:$0xff]   ;;  %v4004_v30 = vld [vmem:[#allocation10 + $0x40] ss:$16 sps:$4 sm:$0xff]   ;;  %v4009_v31 = vld [vmem:[#allocation10 + $0x48] ss:$16 sps:$4 sm:$0xff]  }
 0x183   :  { %422 = vmatprep.subr.bf16.mxu1 %v3977_v7  ;;  %v4012_v32 = vld [vmem:[#allocation10 + $0x64] ss:$16 sps:$4 sm:$0xff]   ;;  %v4013_v33 = vld [vmem:[#allocation10 + $0x6c] ss:$16 sps:$4 sm:$0xff]   ;;  %v4010_v34 = vld [vmem:[#allocation10 + $0x60] ss:$16 sps:$4 sm:$0xff]  }
 0x184   :  { %v4015_v35 = vld [vmem:[#allocation10 + $0x68] ss:$16 sps:$4 sm:$0xff]   ;;  %v4018_v36 = vld [vmem:[#allocation10 + $0x84] ss:$16 sps:$4 sm:$0xff]   ;;  %v4019_v37 = vld [vmem:[#allocation10 + $0x8c] ss:$16 sps:$4 sm:$0xff]  }
 0x185   :  { %1034 = vmatpush1.bf16.msra.mxu0 %v4003_v27  ;;  %v4016_v38 = vld [vmem:[#allocation10 + $0x80] ss:$16 sps:$4 sm:$0xff]   ;;  %v4021_v39 = vld [vmem:[#allocation10 + $0x88] ss:$16 sps:$4 sm:$0xff]   ;;  %v4024_v40 = vld [vmem:[#allocation10 + $0xa4] ss:$16 sps:$4 sm:$0xff]  }
 0x186   :  { %423 = vmatpush1.bf16.msra.mxu1 %v3979_v8  ;;  %1035 = vmatprep.subr.bf16.mxu0 %v4007_v29  ;;  %v4025_v41 = vld [vmem:[#allocation10 + $0xac] ss:$16 sps:$4 sm:$0xff]   ;;  %v4022_v42 = vld [vmem:[#allocation10 + $0xa0] ss:$16 sps:$4 sm:$0xff]   ;;  %v4027_v43 = vld [vmem:[#allocation10 + $0xa8] ss:$16 sps:$4 sm:$0xff]  }
 0x187   :  { %424 = vmatprep.subr.bf16.mxu1 %v3980_v9  ;;  %v4030_v44 = vld [vmem:[#allocation10 + $0xc4] ss:$16 sps:$4 sm:$0xff]   ;;  %v4031_v45 = vld [vmem:[#allocation10 + $0xcc] ss:$16 sps:$4 sm:$0xff]   ;;  %v4028_v46 = vld [vmem:[#allocation10 + $0xc0] ss:$16 sps:$4 sm:$0xff]  }
 0x188   :  { %v4033_v47 = vld [vmem:[#allocation10 + $0xc8] ss:$16 sps:$4 sm:$0xff]   ;;  %v4036_v48 = vld [vmem:[#allocation10 + $0xe4] ss:$16 sps:$4 sm:$0xff]   ;;  %v4037_v49 = vld [vmem:[#allocation10 + $0xec] ss:$16 sps:$4 sm:$0xff]  }
 0x189   :  { %1036 = vmatpush1.bf16.msra.mxu0 %v4009_v31  ;;  %v4034_v50 = vld [vmem:[#allocation10 + $0xe0] ss:$16 sps:$4 sm:$0xff]   ;;  %v4039_v51 = vld [vmem:[#allocation10 + $0xe8] ss:$16 sps:$4 sm:$0xff]   ;;  %v4042_v52 = vld [vmem:[#allocation10 + $0x104] ss:$16 sps:$4 sm:$0xff]  }
 0x18a   :  { %425 = vmatpush1.bf16.msra.mxu1 %v3982_v10  ;;  %1037 = vmatprep.subr.bf16.mxu0 %v4013_v33  ;;  %v4043_v53 = vld [vmem:[#allocation10 + $0x10c] ss:$16 sps:$4 sm:$0xff]   ;;  %v4040_v54 = vld [vmem:[#allocation10 + $0x100] ss:$16 sps:$4 sm:$0xff]   ;;  %v4045_v55 = vld [vmem:[#allocation10 + $0x108] ss:$16 sps:$4 sm:$0xff]  }
 0x18b   :  { %426 = vmatprep.subr.bf16.mxu1 %v3983_v11  ;;  %v4048_v56 = vld [vmem:[#allocation10 + $0x124] ss:$16 sps:$4 sm:$0xff]   ;;  %v4049_v57 = vld [vmem:[#allocation10 + $0x12c] ss:$16 sps:$4 sm:$0xff]   ;;  %v4046_v58 = vld [vmem:[#allocation10 + $0x120] ss:$16 sps:$4 sm:$0xff]  }
 0x18c   :  { %v4051_v59 = vld [vmem:[#allocation10 + $0x128] ss:$16 sps:$4 sm:$0xff]   ;;  %v4054_v60 = vld [vmem:[#allocation10 + $0x144] ss:$16 sps:$4 sm:$0xff]   ;;  %v4055_v61 = vld [vmem:[#allocation10 + $0x14c] ss:$16 sps:$4 sm:$0xff]  }
 0x18d   :  { %1038 = vmatpush1.bf16.msra.mxu0 %v4015_v35  ;;  %v4052_v62 = vld [vmem:[#allocation10 + $0x140] ss:$16 sps:$4 sm:$0xff]   ;;  %v4057_v63 = vld [vmem:[#allocation10 + $0x148] ss:$16 sps:$4 sm:$0xff]   ;;  %v4060_v1 = vld [vmem:[#allocation10 + $0x164] ss:$16 sps:$4 sm:$0xff]  }
 0x18e   :  { %427 = vmatpush1.bf16.msra.mxu1 %v3985_v12  ;;  %1039 = vmatprep.subr.bf16.mxu0 %v4019_v37  ;;  %v4061_v2 = vld [vmem:[#allocation10 + $0x16c] ss:$16 sps:$4 sm:$0xff]   ;;  %v4058_v3 = vld [vmem:[#allocation10 + $0x160] ss:$16 sps:$4 sm:$0xff]   ;;  %v4063_v4 = vld [vmem:[#allocation10 + $0x168] ss:$16 sps:$4 sm:$0xff]  }
 0x18f   :  { %428 = vmatprep.subr.bf16.mxu1 %v3986_v13  ;;  %v4066_v5 = vld [vmem:[#allocation10 + $0x184] ss:$16 sps:$4 sm:$0xff]   ;;  %v4067_v6 = vld [vmem:[#allocation10 + $0x18c] ss:$16 sps:$4 sm:$0xff]   ;;  %v4064_v7 = vld [vmem:[#allocation10 + $0x180] ss:$16 sps:$4 sm:$0xff]  }
 0x190   :  { %v4069_v8 = vld [vmem:[#allocation10 + $0x188] ss:$16 sps:$4 sm:$0xff]   ;;  %v4072_v9 = vld [vmem:[#allocation10 + $0x1a4] ss:$16 sps:$4 sm:$0xff]   ;;  %v4073_v10 = vld [vmem:[#allocation10 + $0x1ac] ss:$16 sps:$4 sm:$0xff]  }
 0x191   :  { %1040 = vmatpush1.bf16.msra.mxu0 %v4021_v39  ;;  %v4070_v11 = vld [vmem:[#allocation10 + $0x1a0] ss:$16 sps:$4 sm:$0xff]   ;;  %v4075_v12 = vld [vmem:[#allocation10 + $0x1a8] ss:$16 sps:$4 sm:$0xff]   ;;  %v4078_v13 = vld [vmem:[#allocation10 + $0x1c4] ss:$16 sps:$4 sm:$0xff]  }
 0x192   :  { %429 = vmatpush1.bf16.msra.mxu1 %v3988_v14  ;;  %1041 = vmatprep.subr.bf16.mxu0 %v4025_v41  ;;  %v4079_v14 = vld [vmem:[#allocation10 + $0x1cc] ss:$16 sps:$4 sm:$0xff]   ;;  %v4084_v17 = vld [vmem:[#allocation10 + $0x1e4] ss:$16 sps:$4 sm:$0xff]   ;;  %s5694_s24 = sld [smem:[#allocation48_spill]]  ;;  %s5004_s6 = smov [#allocation32]  }
 0x193   :  { %430 = vmatprep.subr.bf16.mxu1 %v3989_v15  ;;  %v4076_v15 = vld [vmem:[#allocation10 + $0x1c0] ss:$16 sps:$4 sm:$0xff]   ;;  %v4085_v18 = vld [vmem:[#allocation10 + $0x1ec] ss:$16 sps:$4 sm:$0xff]   ;;  %s3522_s10 = sshll.u32 %s5004_s6, 4  ;;  %s3523_s10 = int_to_ptr.vmem [resolvable:$true] %s3522_s10 }
 0x194   :  { %s4888_s13 = scalar_lea.vmem %s3523_s10, 256  ;;  %p4893_p5 = scmp.lt.s32.totalorder %s3523_s10, %s3523_s10 }
 0x195   :  { %1042 = vmatpush1.bf16.msra.mxu0 %v4027_v43  ;;  %p4889_p4 = scmp.ne.s32.totalorder %s3523_s10, %s4888_s13  ;;  %p4894_p6 = scmp.lt.s32.totalorder %s4888_s13, %s4888_s13 }
 0x196   :  { %431 = vmatpush1.bf16.msra.mxu1 %v3991_v16  ;;  %1043 = vmatprep.subr.bf16.mxu0 %v4031_v45  ;;  %v4081_v16 = vld [vmem:[#allocation10 + $0x1c8] ss:$16 sps:$4 sm:$0xff]  }
 0x197   :  { %988 = vmatprep.subr.bf16.mxu1 %v3994_v20  ;;  %v4087_v20 = vld [vmem:[#allocation10 + $0x1e8] ss:$16 sps:$4 sm:$0xff]   ;;  %p4895_p7 = por %p4894_p6, %p4893_p5 }
 0x199   :  { %449 = vmatmul.mubr.bf16.vlgmr.msra.gmra.mrb[0].mxu1 %v307_v19  ;;  %1044 = vmatpush1.bf16.msra.mxu0 %v4033_v47  ;;  %v4082_v19 = vld [vmem:[#allocation10 + $0x1e0] ss:$16 sps:$4 sm:$0xff]   ;;  %p4896_p8 = pnand %p4895_p7, %p4889_p4 }
 0x19a   :  { %989 = vmatpush1.bf16.msra.mxu1 %v3992_v22  ;;  %1045 = vmatprep.subr.bf16.mxu0 %v4037_v49  ;;  %v5383_v22 = vshrl.u32 %v326_v21, 7 }
 0x19b   :  { %990 = vmatprep.subr.bf16.mxu1 %v4000_v24  ;;  %v324_v24 = vld [vmem:[#allocation5] sm:$0x3] }
 0x19c   :  { %v5386_v23 = vsub.s32 0, %v5383_v22  ;;  %v5389_v25 = vsub.s32 1, %v5383_v22 }
 0x19d   :  { %1046 = vmatpush1.bf16.msra.mxu0 %v4039_v51 }
 0x19e   :  { %991 = vmatpush1.bf16.msra.mxu1 %v3998_v26  ;;  %1047 = vmatprep.subr.bf16.mxu0 %v4043_v53  ;;  %v329_v26 = vrot.slane %v324_v24, %v5386_v23  ;;  %v333_v27 = vrot.slane %v324_v24, %v5389_v25 }
 0x19f   :  { %992 = vmatprep.subr.bf16.mxu1 %v4006_v28 }
 0x1a1   :  { %1048 = vmatpush1.bf16.msra.mxu0 %v4045_v55 }
 0x1a2   :  { %993 = vmatpush1.bf16.msra.mxu1 %v4004_v30  ;;  %1049 = vmatprep.subr.bf16.mxu0 %v4049_v57 }
 0x1a3   :  { %994 = vmatprep.subr.bf16.mxu1 %v4012_v32 }
 0x1a5   :  { %1050 = vmatpush1.bf16.msra.mxu0 %v4051_v59 }
 0x1a6   :  { %995 = vmatpush1.bf16.msra.mxu1 %v4010_v34  ;;  %1051 = vmatprep.subr.bf16.mxu0 %v4055_v61 }
 0x1a7   :  { %996 = vmatprep.subr.bf16.mxu1 %v4018_v36 }
 0x1a9   :  { %1052 = vmatpush1.bf16.msra.mxu0 %v4057_v63 }
 0x1aa   :  { %997 = vmatpush1.bf16.msra.mxu1 %v4016_v38  ;;  %1053 = vmatprep.subr.bf16.mxu0 %v4061_v2 }
 0x1ab   :  { %998 = vmatprep.subr.bf16.mxu1 %v4024_v40 }
 0x1ad   :  { %1054 = vmatpush1.bf16.msra.mxu0 %v4063_v4 }
 0x1ae   :  { %999 = vmatpush1.bf16.msra.mxu1 %v4022_v42  ;;  %1055 = vmatprep.subr.bf16.mxu0 %v4067_v6 }
 0x1af   :  { %1000 = vmatprep.subr.bf16.mxu1 %v4030_v44 }
 0x1b1   :  { %1056 = vmatpush1.bf16.msra.mxu0 %v4069_v8 }
 0x1b2   :  { %1001 = vmatpush1.bf16.msra.mxu1 %v4028_v46  ;;  %1057 = vmatprep.subr.bf16.mxu0 %v4073_v10 }
 0x1b3   :  { %1002 = vmatprep.subr.bf16.mxu1 %v4036_v48 }
 0x1b5   :  { %1058 = vmatpush1.bf16.msra.mxu0 %v4075_v12 }
 0x1b6   :  { %1003 = vmatpush1.bf16.msra.mxu1 %v4034_v50  ;;  %1059 = vmatprep.subr.bf16.mxu0 %v4079_v14 }
 0x1b7   :  { %1004 = vmatprep.subr.bf16.mxu1 %v4042_v52 }
 0x1b9   :  { %1060 = vmatpush1.bf16.msra.mxu0 %v4081_v16 }
 0x1ba   :  { %1005 = vmatpush1.bf16.msra.mxu1 %v4040_v54  ;;  %1061 = vmatprep.subr.bf16.mxu0 %v4085_v18 }
 0x1bb   :  { %1006 = vmatprep.subr.bf16.mxu1 %v4048_v56 }
 0x1bd   :  { %1062 = vmatpush1.bf16.msra.mxu0 %v4087_v20 }
 0x1be   :  { %1007 = vmatpush1.bf16.msra.mxu1 %v4046_v58 }
 0x1bf   :  { %1008 = vmatprep.subr.bf16.mxu1 %v4054_v60 }
 0x1c2   :  { %1009 = vmatpush1.bf16.msra.mxu1 %v4052_v62 }
 0x1c3   :  { %1010 = vmatprep.subr.bf16.mxu1 %v4060_v1 }
 0x1c6   :  { %1011 = vmatpush1.bf16.msra.mxu1 %v4058_v3 }
 0x1c7   :  { %1012 = vmatprep.subr.bf16.mxu1 %v4066_v5 }
 0x1ca   :  { %1013 = vmatpush1.bf16.msra.mxu1 %v4064_v7 }
 0x1cb   :  { %1014 = vmatprep.subr.bf16.mxu1 %v4072_v9 }
 0x1ce   :  { %1015 = vmatpush1.bf16.msra.mxu1 %v4070_v11 }
 0x1cf   :  { %1016 = vmatprep.subr.bf16.mxu1 %v4078_v13 }
 0x1d2   :  { %1017 = vmatpush1.bf16.msra.mxu1 %v4076_v15  ;;  %v5003_v15 = vmov 1966171168  }
 0x1d3   :  { %1018 = vmatprep.subr.bf16.mxu1 %v4084_v17  ;;  %v509_v16 = vunpack.c.l.s4 %v5003_v15  ;;  %v4126_v15 = vld [vmem:[#allocation13 + $0xc4] ss:$8 sps:$4 sm:$0xff]  }
 0x1d5   :  { %v510_v17 = vunpack.c.0.s8 %v509_v16  ;;  %v4124_v16 = vld [vmem:[#allocation13 + $0xc0] ss:$8 sps:$4 sm:$0xff]  }
 0x1d6   :  { %1019 = vmatpush1.bf16.msra.mxu1 %v4082_v19 }
 0x1d7   :  { %v5409_v19 = vsub.s32 %v510_v17, %v5383_v22  ;;  %v4129_v17 = vld [vmem:[#allocation13 + $0xd4] ss:$8 sps:$4 sm:$0xff]  }
 0x26c   :  { %v450_v28 = vpop.f32.mrb[0].mxu1 }
 0x26d   :  { %v5393_v29 = vadd.f32 %v450_v28, %v329_v26  ;;  %v452_v30 = vpop.f32.mrb[1].mxu1 }
 0x26e   :  { %v5395_v31 = vadd.f32 %v452_v30, %v333_v27  ;;  %v454_v32 = vpop.f32.mrb[2].mxu1 }
 0x26f   :  { %v5397_v33 = vadd.f32 %v454_v32, %v329_v26  ;;  %v456_v34 = vpop.f32.mrb[3].mxu1  ;;  %v476_v36 = vmul.f32 %v5393_v29, %v5393_v29  ;;  %v500_v26 = vld [vmem:[#allocation7] sm:$0x3] }
 0x270   :  { %v457_v35 = vadd.f32 %v456_v34, %v333_v27  ;;  %v477_v39 = vmul.f32 %v5395_v31, %v5395_v31 }
 0x271   :  { %v459_v37 = vadd.f32 %v5397_v33, %v5393_v29  ;;  %v478_v38 = vmul.f32 %v5397_v33, %v5397_v33 }
 0x272   :  { %v466_v40 = vadd.f32 %v457_v35, %v5395_v31  ;;  %v479_v41 = vmul.f32 %v457_v35, %v457_v35 }
 0x273   :  { %v460_v42 = vrot.slane %v459_v37, 4  ;;  %v480_v43 = vadd.f32 %v478_v38, %v476_v36 }
 0x274   :  { %v467_v44 = vrot.slane %v466_v40, 4  ;;  %v487_v45 = vadd.f32 %v479_v41, %v477_v39 }
 0x275   :  { %v461_v46 = vadd.f32 %v460_v42, %v459_v37  ;;  %v481_v47 = vrot.slane %v480_v43, 4 }
 0x276   :  { %v468_v48 = vadd.f32 %v467_v44, %v466_v40  ;;  %v488_v49 = vrot.slane %v487_v45, 4 }
 0x277   :  { %v462_v50 = vrot.slane %v461_v46, 2  ;;  %v482_v51 = vadd.f32 %v481_v47, %v480_v43  ;;  %v524_v43 = vld [vmem:[#allocation8] sm:$0x3] }
 0x278   :  { %v469_v52 = vrot.slane %v468_v48, 2  ;;  %v489_v53 = vadd.f32 %v488_v49, %v487_v45 }
 0x279   :  { %v463_v54 = vadd.f32 %v462_v50, %v461_v46  ;;  %v483_v55 = vrot.slane %v482_v51, 2 }
 0x27a   :  { %v470_v56 = vadd.f32 %v469_v52, %v468_v48  ;;  %v490_v57 = vrot.slane %v489_v53, 2 }
 0x27b   :  { %v464_v58 = vrot.slane %v463_v54, 1  ;;  %v484_v59 = vadd.f32 %v483_v55, %v482_v51  ;;  %v4088_v55 = vld [vmem:[#allocation13] ss:$8 sps:$4 sm:$0xff]  }
 0x27c   :  { %v471_v60 = vrot.slane %v470_v56, 1  ;;  %v491_v61 = vadd.f32 %v490_v57, %v489_v53  ;;  %v4091_v57 = vld [vmem:[#allocation13 + $0x10] ss:$8 sps:$4 sm:$0xff]  }
 0x27d   :  { %v465_v62 = vadd.f32 %v464_v58, %v463_v54  ;;  %v485_v63 = vrot.slane %v484_v59, 1  ;;  %v4090_v54 = vld [vmem:[#allocation13 + $0x4] ss:$8 sps:$4 sm:$0xff]  }
 0x27e   :  { %v472_v1 = vadd.f32 %v471_v60, %v470_v56  ;;  %v492_v2 = vrot.slane %v491_v61, 1  ;;  %1694 = vmatprep.subr.bf16.mxu1 %v4090_v54  ;;  %v4093_v56 = vld [vmem:[#allocation13 + $0x14] ss:$8 sps:$4 sm:$0xff]   ;;  %v4096_v58 = vld [vmem:[#allocation13 + $0x24] ss:$8 sps:$4 sm:$0xff]  }
 0x27f   :  { %v474_v3 = vmul.f32 0.0625, %v465_v62  ;;  %v486_v4 = vadd.f32 %v485_v63, %v484_v59  ;;  %v4094_v59 = vld [vmem:[#allocation13 + $0x20] ss:$8 sps:$4 sm:$0xff]   ;;  %v4099_v60 = vld [vmem:[#allocation13 + $0x34] ss:$8 sps:$4 sm:$0xff]  }
 0x280   :  { %v475_v5 = vmul.f32 0.0625, %v472_v1  ;;  %v493_v6 = vadd.f32 %v492_v2, %v491_v61  ;;  %v4097_v61 = vld [vmem:[#allocation13 + $0x30] ss:$8 sps:$4 sm:$0xff]   ;;  %v4102_v62 = vld [vmem:[#allocation13 + $0x44] ss:$8 sps:$4 sm:$0xff]  }
 0x281   :  { %v494_v7 = vmul.f32 0.0625, %v486_v4  ;;  %v496_v8 = vmul.f32 %v474_v3, %v474_v3  ;;  %v4100_v63 = vld [vmem:[#allocation13 + $0x40] ss:$8 sps:$4 sm:$0xff]   ;;  %v4105_v1 = vld [vmem:[#allocation13 + $0x54] ss:$8 sps:$4 sm:$0xff]  }
 0x282   :  { %v495_v9 = vmul.f32 0.0625, %v493_v6  ;;  %v497_v10 = vmul.f32 %v475_v5, %v475_v5  ;;  %v4103_v2 = vld [vmem:[#allocation13 + $0x50] ss:$8 sps:$4 sm:$0xff]   ;;  %v4106_v4 = vld [vmem:[#allocation13 + $0x60] ss:$8 sps:$4 sm:$0xff]  }
 0x283   :  { %v498_v11 = vsub.f32 %v494_v7, %v496_v8  ;;  %v4109_v6 = vld [vmem:[#allocation13 + $0x70] ss:$8 sps:$4 sm:$0xff]   ;;  %v4114_v7 = vld [vmem:[#allocation13 + $0x84] ss:$8 sps:$4 sm:$0xff]   ;;  %v4112_v8 = vld [vmem:[#allocation13 + $0x80] ss:$8 sps:$4 sm:$0xff]  }
 0x284   :  { %v499_v12 = vsub.f32 %v495_v9, %v497_v10  ;;  %v4117_v9 = vld [vmem:[#allocation13 + $0x94] ss:$8 sps:$4 sm:$0xff]   ;;  %v4115_v10 = vld [vmem:[#allocation13 + $0x90] ss:$8 sps:$4 sm:$0xff]  }
 0x285   :  { %v501_v13 = vadd.f32 1e-05, %v498_v11  ;;  %v4120_v11 = vld [vmem:[#allocation13 + $0xa4] ss:$8 sps:$4 sm:$0xff]  }
 0x286   :  { %v502_v14 = vadd.f32 1e-05, %v499_v12  ;;  %v4118_v12 = vld [vmem:[#allocation13 + $0xa0] ss:$8 sps:$4 sm:$0xff]  }
 0x287   :  { %4464 = vrsqrt.f32 %v501_v13  ;;  %v4123_v13 = vld [vmem:[#allocation13 + $0xb4] ss:$8 sps:$4 sm:$0xff]  }
 0x288   :  { %4466 = vrsqrt.f32 %v502_v14  ;;  %v4121_v14 = vld [vmem:[#allocation13 + $0xb0] ss:$8 sps:$4 sm:$0xff]  }
 0x291   :  { %v4465_v18 = vpop.eup %4464 }
 0x292   :  { %v4467_v20 = vpop.eup %4466 }
 0x293   :  { %v507_v21 = vcombine.low %v4465_v18, %v4467_v20  ;;  %v4127_v18 = vld [vmem:[#allocation13 + $0xd0] ss:$8 sps:$4 sm:$0xff]   ;;  %v4132_v20 = vld [vmem:[#allocation13 + $0xe4] ss:$8 sps:$4 sm:$0xff]  }
 0x295   :  { %v514_v24 = vrot.slane %v507_v21, %v5409_v19  ;;  %v4130_v21 = vld [vmem:[#allocation13 + $0xe0] ss:$8 sps:$4 sm:$0xff]  }
 0x297   :  { %v521_v27 = vrot.slane %v514_v24, %v5409_v19  ;;  %v4135_v24 = vld [vmem:[#allocation13 + $0xf4] ss:$8 sps:$4 sm:$0xff]  }
 0x299   :  { %v523_v28 = vmul.f32 %v521_v27, %v500_v26  ;;  %v4133_v26 = vld [vmem:[#allocation13 + $0xf0] ss:$8 sps:$4 sm:$0xff]   ;;  %v4138_v27 = vld [vmem:[#allocation13 + $0x104] ss:$8 sps:$4 sm:$0xff]  }
 0x29b   :  { %v529_v30 = vrot.slane %v523_v28, %v5386_v23  ;;  %v533_v32 = vrot.slane %v523_v28, %v5389_v25  ;;  %v5423_v28 = vsub.s32 2, %v5383_v22 }
 0x29d   :  { %v536_v34 = vmul.f32 %v529_v30, %v474_v3  ;;  %v537_v36 = vmul.f32 %v533_v32, %v475_v5  ;;  %v560_v37 = vmul.f32 %v533_v32, %v457_v35  ;;  %v558_v38 = vmul.f32 %v533_v32, %v5395_v31  ;;  %v4108_v3 = vld [vmem:[#allocation13 + $0x64] ss:$8 sps:$4 sm:$0xff]   ;;  %v4111_v5 = vld [vmem:[#allocation13 + $0x74] ss:$8 sps:$4 sm:$0xff]  }
 0x29e   :  { %v557_v39 = vmul.f32 %v529_v30, %v5393_v29  ;;  %v559_v40 = vmul.f32 %v529_v30, %v5397_v33  ;;  %v646_v30 = vld [vmem:[%s5692_s14] sm:$0xf]  ;;  %v5429_v32 = vsub.s32 3, %v5383_v22 }
 0x29f   :  { %v540_v41 = vcombine.low %v536_v34, %v537_v36  ;;  %v651_v34 = vrot.slane %v646_v30, %v5386_v23  ;;  %v659_v36 = vrot.slane %v646_v30, %v5423_v28 }
 0x2a1   :  { %v547_v42 = vrot.slane %v540_v41, %v5409_v19 }
 0x2a3   :  { %v554_v44 = vrot.slane %v547_v42, %v5409_v19 }
 0x2a5   :  { %v556_v45 = vsub.f32 %v524_v43, %v554_v44 }
 0x2a7   :  { %v569_v46 = vrot.slane %v556_v45, %v5389_v25  ;;  %v565_v47 = vrot.slane %v556_v45, %v5386_v23 }
 0x2a9   :  { %v573_v48 = vadd.f32 %v569_v46, %v558_v38  ;;  %v575_v49 = vadd.f32 %v569_v46, %v560_v37  ;;  %v572_v35 = vadd.f32 %v565_v47, %v557_v39  ;;  %v574_v50 = vadd.f32 %v565_v47, %v559_v40 }
 0x2aa   :  { %v655_v37 = vrot.slane %v646_v30, %v5389_v25  ;;  %v663_v38 = vrot.slane %v646_v30, %v5429_v32 }
 0x2ab   :  { %v577_v31 = vmax.f32 %v573_v48, 0.0  ;;  %v579_v51 = vmax.f32 %v575_v49, 0.0  ;;  %v576_v29 = vmax.f32 %v572_v35, 0.0  ;;  %v578_v52 = vmax.f32 %v574_v50, 0.0 }
 0x2ad   :  { %v581_v33 = vpack.c.bf16 %v579_v51, %v577_v31  ;;  %v580_v53 = vpack.c.bf16 %v578_v52, %v576_v29 }
 0x2af   :  { %1020 = vmatprep.mubr.bf16.mxu1 %v581_v33  ;;  %1063 = vmatprep.mubr.bf16.mxu0 %v581_v33 }
 0x2b0   :  { %1021 = vmatmul.mubr.bf16.vlgmr.msra.gmra.mrb[4].mxu1 %v580_v53  ;;  %1064 = vmatmul.mubr.bf16.vlgmr.msra.gmra.mrb[0].mxu0 %v580_v53 }
 0x2b1   :  { %1695 = vmatpush1.bf16.msra.mxu1 %v4088_v55 }
 0x2b2   :  { %1696 = vmatprep.subr.bf16.mxu1 %v4093_v56 }
 0x2b5   :  { %1697 = vmatpush1.bf16.msra.mxu1 %v4091_v57 }
 0x2b6   :  { %1698 = vmatprep.subr.bf16.mxu1 %v4096_v58 }
 0x2b9   :  { %1699 = vmatpush1.bf16.msra.mxu1 %v4094_v59 }
 0x2ba   :  { %1700 = vmatprep.subr.bf16.mxu1 %v4099_v60 }
 0x2bd   :  { %1701 = vmatpush1.bf16.msra.mxu1 %v4097_v61 }
 0x2be   :  { %1702 = vmatprep.subr.bf16.mxu1 %v4102_v62 }
 0x2c1   :  { %1703 = vmatpush1.bf16.msra.mxu1 %v4100_v63 }
 0x2c2   :  { %1704 = vmatprep.subr.bf16.mxu1 %v4105_v1 }
 0x2c5   :  { %1705 = vmatpush1.bf16.msra.mxu1 %v4103_v2 }
 0x2c6   :  { %1706 = vmatprep.subr.bf16.mxu1 %v4108_v3 }
 0x2c9   :  { %1707 = vmatpush1.bf16.msra.mxu1 %v4106_v4 }
 0x2ca   :  { %1708 = vmatprep.subr.bf16.mxu1 %v4111_v5 }
 0x2cd   :  { %1709 = vmatpush1.bf16.msra.mxu1 %v4109_v6 }
 0x2ce   :  { %1710 = vmatprep.subr.bf16.mxu1 %v4114_v7 }
 0x2d1   :  { %1711 = vmatpush1.bf16.msra.mxu1 %v4112_v8 }
 0x2d2   :  { %1712 = vmatprep.subr.bf16.mxu1 %v4117_v9 }
 0x2d5   :  { %1713 = vmatpush1.bf16.msra.mxu1 %v4115_v10 }
 0x2d6   :  { %1714 = vmatprep.subr.bf16.mxu1 %v4120_v11 }
 0x2d9   :  { %1715 = vmatpush1.bf16.msra.mxu1 %v4118_v12 }
 0x2da   :  { %1716 = vmatprep.subr.bf16.mxu1 %v4123_v13 }
 0x2dd   :  { %1717 = vmatpush1.bf16.msra.mxu1 %v4121_v14 }
 0x2de   :  { %1718 = vmatprep.subr.bf16.mxu1 %v4126_v15 }
 0x2e1   :  { %1719 = vmatpush1.bf16.msra.mxu1 %v4124_v16 }
 0x2e2   :  { %1720 = vmatprep.subr.bf16.mxu1 %v4129_v17 }
 0x2e5   :  { %1721 = vmatpush1.bf16.msra.mxu1 %v4127_v18 }
 0x2e6   :  { %1722 = vmatprep.subr.bf16.mxu1 %v4132_v20 }
 0x2e9   :  { %1723 = vmatpush1.bf16.msra.mxu1 %v4130_v21 }
 0x2ea   :  { %1724 = vmatprep.subr.bf16.mxu1 %v4135_v24 }
 0x2ed   :  { %1725 = vmatpush1.bf16.msra.mxu1 %v4133_v26 }
 0x2ee   :  { %1737 = vmatprep.subr.bf16.mxu1 %v4138_v27 }
 0x383   :  { %v1022_v39 = vpop.f32.mrb[4].mxu1  ;;  %v1065_v40 = vpop.f32.mrb[0].mxu0 }
 0x384   :  { %v5435_v41 = vadd.f32 %v1022_v39, %v651_v34  ;;  %v5437_v42 = vadd.f32 %v1065_v40, %v659_v36  ;;  %v1024_v43 = vpop.f32.mrb[5].mxu1  ;;  %v1067_v44 = vpop.f32.mrb[1].mxu0 }
 0x385   :  { %v5439_v45 = vadd.f32 %v1024_v43, %v655_v37  ;;  %v5441_v22 = vadd.f32 %v1067_v44, %v663_v38  ;;  %v1026_v46 = vpop.f32.mrb[6].mxu1  ;;  %v1069_v47 = vpop.f32.mrb[2].mxu0 }
 0x386   :  { %v1106_v48 = vmul.f32 %v5435_v41, %v5435_v41  ;;  %v1108_v49 = vmul.f32 %v5437_v42, %v5437_v42  ;;  %v5447_v35 = vadd.f32 %v1026_v46, %v651_v34  ;;  %v5449_v50 = vadd.f32 %v1069_v47, %v659_v36  ;;  %v1028_v31 = vpop.f32.mrb[7].mxu1  ;;  %v1071_v51 = vpop.f32.mrb[3].mxu0 }
 0x387   :  { %v1107_v29 = vmul.f32 %v5439_v45, %v5439_v45  ;;  %v1109_v52 = vmul.f32 %v5441_v22, %v5441_v22  ;;  %v5455_v33 = vadd.f32 %v1028_v31, %v655_v37  ;;  %v5457_v53 = vadd.f32 %v1071_v51, %v663_v38 }
 0x388   :  { %v1074_v54 = vadd.f32 %v5447_v35, %v5435_v41  ;;  %v1110_v55 = vmul.f32 %v5447_v35, %v5447_v35  ;;  %v1088_v56 = vadd.f32 %v5449_v50, %v5437_v42  ;;  %v1112_v57 = vmul.f32 %v5449_v50, %v5449_v50 }
 0x389   :  { %v1081_v58 = vadd.f32 %v5455_v33, %v5439_v45  ;;  %v1111_v59 = vmul.f32 %v5455_v33, %v5455_v33  ;;  %v1095_v60 = vadd.f32 %v5457_v53, %v5441_v22  ;;  %v1113_v61 = vmul.f32 %v5457_v53, %v5457_v53 }
 0x38a   :  { %v1075_v62 = vrot.slane %v1074_v54, 4  ;;  %v1114_v63 = vadd.f32 %v1110_v55, %v1106_v48  ;;  %v1089_v1 = vrot.slane %v1088_v56, 4  ;;  %v1128_v2 = vadd.f32 %v1112_v57, %v1108_v49 }
 0x38b   :  { %v1082_v3 = vrot.slane %v1081_v58, 4  ;;  %v1121_v4 = vadd.f32 %v1111_v59, %v1107_v29  ;;  %v1096_v5 = vrot.slane %v1095_v60, 4  ;;  %v1135_v6 = vadd.f32 %v1113_v61, %v1109_v52 }
 0x38c   :  { %v1076_v7 = vadd.f32 %v1075_v62, %v1074_v54  ;;  %v1115_v8 = vrot.slane %v1114_v63, 4  ;;  %v1090_v9 = vadd.f32 %v1089_v1, %v1088_v56  ;;  %v1129_v10 = vrot.slane %v1128_v2, 4 }
 0x38d   :  { %v1083_v11 = vadd.f32 %v1082_v3, %v1081_v58  ;;  %v1122_v12 = vrot.slane %v1121_v4, 4  ;;  %v1097_v13 = vadd.f32 %v1096_v5, %v1095_v60  ;;  %v1136_v14 = vrot.slane %v1135_v6, 4 }
 0x38e   :  { %v1077_v15 = vrot.slane %v1076_v7, 2  ;;  %v1116_v16 = vadd.f32 %v1115_v8, %v1114_v63  ;;  %v1091_v17 = vrot.slane %v1090_v9, 2  ;;  %v1130_v18 = vadd.f32 %v1129_v10, %v1128_v2 }
 0x38f   :  { %v1084_v20 = vrot.slane %v1083_v11, 2  ;;  %v1123_v21 = vadd.f32 %v1122_v12, %v1121_v4  ;;  %v1098_v24 = vrot.slane %v1097_v13, 2  ;;  %v1137_v26 = vadd.f32 %v1136_v14, %v1135_v6 }
 0x390   :  { %v1078_v27 = vadd.f32 %v1077_v15, %v1076_v7  ;;  %v1117_v30 = vrot.slane %v1116_v16, 2  ;;  %v1092_v34 = vadd.f32 %v1091_v17, %v1090_v9  ;;  %v1131_v36 = vrot.slane %v1130_v18, 2 }
 0x391   :  { %v1085_v37 = vadd.f32 %v1084_v20, %v1083_v11  ;;  %v1124_v38 = vrot.slane %v1123_v21, 2  ;;  %v1099_v39 = vadd.f32 %v1098_v24, %v1097_v13  ;;  %v1138_v40 = vrot.slane %v1137_v26, 2 }
 0x392   :  { %v1079_v43 = vrot.slane %v1078_v27, 1  ;;  %v1118_v44 = vadd.f32 %v1117_v30, %v1116_v16  ;;  %v1093_v46 = vrot.slane %v1092_v34, 1  ;;  %v1132_v47 = vadd.f32 %v1131_v36, %v1130_v18 }
 0x393   :  { %v1086_v48 = vrot.slane %v1085_v37, 1  ;;  %v1125_v49 = vadd.f32 %v1124_v38, %v1123_v21  ;;  %v1100_v31 = vrot.slane %v1099_v39, 1  ;;  %v1139_v51 = vadd.f32 %v1138_v40, %v1137_v26  ;;  %v1154_v40 = vld [vmem:[%s5693_s5] sm:$0xf] }
 0x394   :  { %v1080_v29 = vadd.f32 %v1079_v43, %v1078_v27  ;;  %v1119_v52 = vrot.slane %v1118_v44, 1  ;;  %v1094_v54 = vadd.f32 %v1093_v46, %v1092_v34  ;;  %v1133_v55 = vrot.slane %v1132_v47, 1 }
 0x395   :  { %v1087_v56 = vadd.f32 %v1086_v48, %v1085_v37  ;;  %v1126_v57 = vrot.slane %v1125_v49, 1  ;;  %v1101_v58 = vadd.f32 %v1100_v31, %v1099_v39  ;;  %v1140_v59 = vrot.slane %v1139_v51, 1 }
 0x396   :  { %v1102_v60 = vmul.f32 0.0625, %v1080_v29  ;;  %v1120_v61 = vadd.f32 %v1119_v52, %v1118_v44  ;;  %v1104_v62 = vmul.f32 0.0625, %v1094_v54  ;;  %v1134_v63 = vadd.f32 %v1133_v55, %v1132_v47 }
 0x397   :  { %v1103_v1 = vmul.f32 0.0625, %v1087_v56  ;;  %v1127_v2 = vadd.f32 %v1126_v57, %v1125_v49  ;;  %v1105_v3 = vmul.f32 0.0625, %v1101_v58  ;;  %v1141_v4 = vadd.f32 %v1140_v59, %v1139_v51 }
 0x398   :  { %v1142_v5 = vmul.f32 0.0625, %v1120_v61  ;;  %v1146_v6 = vmul.f32 %v1102_v60, %v1102_v60  ;;  %v1144_v7 = vmul.f32 0.0625, %v1134_v63  ;;  %v1148_v8 = vmul.f32 %v1104_v62, %v1104_v62 }
 0x399   :  { %v1143_v9 = vmul.f32 0.0625, %v1127_v2  ;;  %v1147_v10 = vmul.f32 %v1103_v1, %v1103_v1  ;;  %v1145_v11 = vmul.f32 0.0625, %v1141_v4  ;;  %v1149_v12 = vmul.f32 %v1105_v3, %v1105_v3 }
 0x39a   :  { %v1150_v13 = vsub.f32 %v1142_v5, %v1146_v6  ;;  %v1152_v14 = vsub.f32 %v1144_v7, %v1148_v8 }
 0x39b   :  { %v1151_v15 = vsub.f32 %v1143_v9, %v1147_v10  ;;  %v1153_v16 = vsub.f32 %v1145_v11, %v1149_v12 }
 0x39c   :  { %v1155_v17 = vadd.f32 1e-05, %v1150_v13  ;;  %v1157_v18 = vadd.f32 1e-05, %v1152_v14 }
 0x39d   :  { %v1156_v20 = vadd.f32 1e-05, %v1151_v15  ;;  %v1158_v21 = vadd.f32 1e-05, %v1153_v16 }
 0x39e   :  { %4468 = vrsqrt.f32 %v1155_v17 }
 0x39f   :  { %4470 = vrsqrt.f32 %v1157_v18 }
 0x3a0   :  { %4472 = vrsqrt.f32 %v1156_v20 }
 0x3a1   :  { %4474 = vrsqrt.f32 %v1158_v21  ;;  %v4136_v21 = vld [vmem:[#allocation13 + $0x100] ss:$8 sps:$4 sm:$0xff]  }
 0x3a8   :  { %v4469_v24 = vpop.eup %4468 }
 0x3a9   :  { %v4471_v26 = vpop.eup %4470 }
 0x3aa   :  { %v4473_v27 = vpop.eup %4472 }
 0x3ab   :  { %v4475_v30 = vpop.eup %4474  ;;  %v1167_v34 = vcombine.low %v4469_v24, %v4473_v27  ;;  %v4141_v27 = vld [vmem:[#allocation13 + $0x114] ss:$8 sps:$4 sm:$0xff]  }
 0x3ac   :  { %v1168_v36 = vcombine.low %v4471_v26, %v4475_v30 }
 0x3ad   :  { %v1175_v37 = vrot.slane %v1167_v34, %v5409_v19  ;;  %v4139_v34 = vld [vmem:[#allocation13 + $0x110] ss:$8 sps:$4 sm:$0xff]  }
 0x3ae   :  { %v1182_v38 = vrot.slane %v1168_v36, %v5409_v19  ;;  %v4144_v36 = vld [vmem:[#allocation13 + $0x124] ss:$8 sps:$4 sm:$0xff]  }
 0x3b0   :  { %v1183_v39 = vcombine.low %v1175_v37, %v1182_v38  ;;  %v4142_v37 = vld [vmem:[#allocation13 + $0x120] ss:$8 sps:$4 sm:$0xff]   ;;  %v4147_v38 = vld [vmem:[#allocation13 + $0x134] ss:$8 sps:$4 sm:$0xff]  }
 0x3b2   :  { %v1190_v43 = vrot.slane %v1183_v39, %v5409_v19  ;;  %v4145_v39 = vld [vmem:[#allocation13 + $0x130] ss:$8 sps:$4 sm:$0xff]  }
 0x3b4   :  { %v1192_v44 = vmul.f32 %v1190_v43, %v1154_v40  ;;  %v4150_v40 = vld [vmem:[#allocation13 + $0x144] ss:$8 sps:$4 sm:$0xff]   ;;  %v4148_v43 = vld [vmem:[#allocation13 + $0x140] ss:$8 sps:$4 sm:$0xff]  }
 0x3b6   :  { %v1198_v46 = vrot.slane %v1192_v44, %v5386_v23  ;;  %v1206_v47 = vrot.slane %v1192_v44, %v5423_v28  ;;  %v1210_v48 = vrot.slane %v1192_v44, %v5429_v32  ;;  %v1202_v49 = vrot.slane %v1192_v44, %v5389_v25  ;;  %v4153_v44 = vld [vmem:[#allocation13 + $0x154] ss:$8 sps:$4 sm:$0xff]  }
 0x3b8   :  { %v1217_v31 = vmul.f32 %v1206_v47, %v1104_v62  ;;  %v1218_v51 = vmul.f32 %v1210_v48, %v1105_v3  ;;  %v1256_v29 = vmul.f32 %v1210_v48, %v5457_v53  ;;  %v1215_v52 = vmul.f32 %v1198_v46, %v1102_v60 }
 0x3b9   :  { %v1216_v54 = vmul.f32 %v1202_v49, %v1103_v1  ;;  %v1250_v55 = vmul.f32 %v1202_v49, %v5439_v45  ;;  %v1254_v56 = vmul.f32 %v1202_v49, %v5455_v33  ;;  %v1249_v57 = vmul.f32 %v1198_v46, %v5435_v41  ;;  %v1193_v45 = vld [vmem:[#allocation11] sm:$0xf] }
 0x3ba   :  { %v1224_v58 = vcombine.low %v1217_v31, %v1218_v51  ;;  %v1253_v59 = vmul.f32 %v1198_v46, %v5447_v35  ;;  %v1252_v61 = vmul.f32 %v1210_v48, %v5441_v22  ;;  %v1251_v63 = vmul.f32 %v1206_v47, %v5437_v42  ;;  %v4151_v46 = vld [vmem:[#allocation13 + $0x150] ss:$8 sps:$4 sm:$0xff]   ;;  %v4154_v48 = vld [vmem:[#allocation13 + $0x160] ss:$8 sps:$4 sm:$0xff]   ;;  %v4159_v49 = vld [vmem:[#allocation13 + $0x174] ss:$8 sps:$4 sm:$0xff]  }
 0x3bb   :  { %v1223_v2 = vcombine.low %v1215_v52, %v1216_v54  ;;  %v1255_v62 = vmul.f32 %v1206_v47, %v5449_v50  ;;  %v4156_v47 = vld [vmem:[#allocation13 + $0x164] ss:$8 sps:$4 sm:$0xff]   ;;  %v4157_v31 = vld [vmem:[#allocation13 + $0x170] ss:$8 sps:$4 sm:$0xff]   ;;  %v4165_v52 = vld [vmem:[#allocation13 + $0x194] ss:$8 sps:$4 sm:$0xff]  }
 0x3bc   :  { %v1238_v53 = vrot.slane %v1224_v58, %v5409_v19  ;;  %v4162_v51 = vld [vmem:[#allocation13 + $0x184] ss:$8 sps:$4 sm:$0xff]   ;;  %v4163_v54 = vld [vmem:[#allocation13 + $0x190] ss:$8 sps:$4 sm:$0xff]  }
 0x3bd   :  { %v1231_v60 = vrot.slane %v1223_v2, %v5409_v19  ;;  %v4169_v58 = vld [vmem:[#allocation13 + $0x1b0] ss:$8 sps:$4 sm:$0xff]  }
 0x3be   :  { %v4175_v2 = vld [vmem:[#allocation13 + $0x1d0] ss:$8 sps:$4 sm:$0xff]  }
 0x3bf   :  { %v1239_v1 = vcombine.low %v1231_v60, %v1238_v53  ;;  %v4178_v53 = vld [vmem:[#allocation13 + $0x1e0] ss:$8 sps:$4 sm:$0xff]   ;;  %v4183_v60 = vld [vmem:[#allocation13 + $0x1f4] ss:$8 sps:$4 sm:$0xff]  }
 0x3c1   :  { %v1246_v33 = vrot.slane %v1239_v1, %v5409_v19  ;;  %v4181_v1 = vld [vmem:[#allocation13 + $0x1f0] ss:$8 sps:$4 sm:$0xff]  }
 0x3c3   :  { %v1248_v3 = vsub.f32 %v1193_v45, %v1246_v33  ;;  %v4186_v45 = vld [vmem:[#allocation19 + $0x4] ss:$8 sps:$4 sm:$0xff]   ;;  %v4184_v33 = vld [vmem:[#allocation19] ss:$8 sps:$4 sm:$0xff]  }
 0x3c4   :  { %2106 = vmatprep.subr.bf16.mxu0 %v4186_v45 }
 0x3c5   :  { %v1265_v41 = vrot.slane %v1248_v3, %v5389_v25  ;;  %v1261_v35 = vrot.slane %v1248_v3, %v5386_v23  ;;  %v1273_v22 = vrot.slane %v1248_v3, %v5429_v32  ;;  %v1269_v42 = vrot.slane %v1248_v3, %v5423_v28  ;;  %2107 = vmatpush1.bf16.msra.mxu0 %v4184_v33  ;;  %v4189_v3 = vld [vmem:[#allocation19 + $0x14] ss:$8 sps:$4 sm:$0xff]  }
 0x3c6   :  { %2108 = vmatprep.subr.bf16.mxu0 %v4189_v3 }
 0x3c7   :  { %v1279_v4 = vadd.f32 %v1265_v41, %v1250_v55  ;;  %v1283_v5 = vadd.f32 %v1265_v41, %v1254_v56  ;;  %v1278_v50 = vadd.f32 %v1261_v35, %v1249_v57  ;;  %v1282_v6 = vadd.f32 %v1261_v35, %v1253_v59  ;;  %v4168_v55 = vld [vmem:[#allocation13 + $0x1a4] ss:$8 sps:$4 sm:$0xff]   ;;  %v4166_v56 = vld [vmem:[#allocation13 + $0x1a0] ss:$8 sps:$4 sm:$0xff]   ;;  %v4171_v57 = vld [vmem:[#allocation13 + $0x1b4] ss:$8 sps:$4 sm:$0xff]  }
 0x3c8   :  { %v1281_v7 = vadd.f32 %v1273_v22, %v1252_v61  ;;  %v1285_v8 = vadd.f32 %v1273_v22, %v1256_v29  ;;  %v1280_v9 = vadd.f32 %v1269_v42, %v1251_v63  ;;  %v1284_v10 = vadd.f32 %v1269_v42, %v1255_v62  ;;  %v4160_v29 = vld [vmem:[#allocation13 + $0x180] ss:$8 sps:$4 sm:$0xff]   ;;  %v4174_v59 = vld [vmem:[#allocation13 + $0x1c4] ss:$8 sps:$4 sm:$0xff]   ;;  %v4177_v63 = vld [vmem:[#allocation13 + $0x1d4] ss:$8 sps:$4 sm:$0xff]  }
 0x3c9   :  { %v1287_v11 = vmax.f32 %v1279_v4, 0.0  ;;  %v1291_v12 = vmax.f32 %v1283_v5, 0.0  ;;  %v1286_v13 = vmax.f32 %v1278_v50, 0.0  ;;  %v1290_v14 = vmax.f32 %v1282_v6, 0.0  ;;  %v4172_v61 = vld [vmem:[#allocation13 + $0x1c0] ss:$8 sps:$4 sm:$0xff]  }
 0x3ca   :  { %v1289_v15 = vmax.f32 %v1281_v7, 0.0  ;;  %v1293_v16 = vmax.f32 %v1285_v8, 0.0  ;;  %v1288_v17 = vmax.f32 %v1280_v9, 0.0  ;;  %v1292_v18 = vmax.f32 %v1284_v10, 0.0  ;;  %v4180_v62 = vld [vmem:[#allocation13 + $0x1e4] ss:$8 sps:$4 sm:$0xff]  }
 0x3cb   :  { %v1295_v20 = vpack.c.bf16 %v1291_v12, %v1287_v11  ;;  %v1294_v24 = vpack.c.bf16 %v1290_v14, %v1286_v13  ;;  %v4187_v41 = vld [vmem:[#allocation19 + $0x10] ss:$8 sps:$4 sm:$0xff]   ;;  %v4192_v35 = vld [vmem:[#allocation19 + $0x24] ss:$8 sps:$4 sm:$0xff]   ;;  %v4190_v22 = vld [vmem:[#allocation19 + $0x20] ss:$8 sps:$4 sm:$0xff]  }
 0x3cc   :  { %v1297_v26 = vpack.c.bf16 %v1293_v16, %v1289_v15  ;;  %v5500_v30 = vpack.c.bf16 %v1292_v18, %v1288_v17  ;;  %2109 = vmatpush1.bf16.msra.mxu0 %v4187_v41  ;;  %v4195_v42 = vld [vmem:[#allocation19 + $0x34] ss:$8 sps:$4 sm:$0xff]   ;;  %v4193_v4 = vld [vmem:[#allocation19 + $0x30] ss:$8 sps:$4 sm:$0xff]   ;;  %v4198_v5 = vld [vmem:[#allocation19 + $0x44] ss:$8 sps:$4 sm:$0xff]  }
 0x3cd   :  { %1726 = vmatprep.mubr.bf16.mxu1 %v1295_v20  ;;  %2110 = vmatprep.subr.bf16.mxu0 %v4192_v35  ;;  %v4196_v50 = vld [vmem:[#allocation19 + $0x40] ss:$8 sps:$4 sm:$0xff]   ;;  %v4201_v6 = vld [vmem:[#allocation19 + $0x54] ss:$8 sps:$4 sm:$0xff]   ;;  %v4199_v7 = vld [vmem:[#allocation19 + $0x50] ss:$8 sps:$4 sm:$0xff]  }
 0x3ce   :  { %1727 = vmatmul.mubr.bf16.vlgmr.msra.gmra.mrb[8].mxu1 %v1294_v24  ;;  %v4204_v8 = vld [vmem:[#allocation19 + $0x64] ss:$8 sps:$4 sm:$0xff]   ;;  %v4202_v9 = vld [vmem:[#allocation19 + $0x60] ss:$8 sps:$4 sm:$0xff]   ;;  %v4207_v10 = vld [vmem:[#allocation19 + $0x74] ss:$8 sps:$4 sm:$0xff]  }
 0x3cf   :  { %1738 = vmatpush1.bf16.msra.mxu1 %v4136_v21  ;;  %1769 = vmatprep.mubr.bf16.mxu1 %v1297_v26  ;;  %v4205_v11 = vld [vmem:[#allocation19 + $0x70] ss:$8 sps:$4 sm:$0xff]   ;;  %v4210_v12 = vld [vmem:[#allocation19 + $0x84] ss:$8 sps:$4 sm:$0xff]   ;;  %v4208_v13 = vld [vmem:[#allocation19 + $0x80] ss:$8 sps:$4 sm:$0xff]  }
 0x3d0   :  { %1739 = vmatprep.subr.bf16.mxu1 %v4141_v27  ;;  %2111 = vmatpush1.bf16.msra.mxu0 %v4190_v22  ;;  %v4213_v14 = vld [vmem:[#allocation19 + $0x94] ss:$8 sps:$4 sm:$0xff]   ;;  %v4211_v15 = vld [vmem:[#allocation19 + $0x90] ss:$8 sps:$4 sm:$0xff]   ;;  %v4216_v16 = vld [vmem:[#allocation19 + $0xa4] ss:$8 sps:$4 sm:$0xff]  }
 0x3d1   :  { %2112 = vmatprep.subr.bf16.mxu0 %v4195_v42  ;;  %v4214_v17 = vld [vmem:[#allocation19 + $0xa0] ss:$8 sps:$4 sm:$0xff]   ;;  %v4219_v18 = vld [vmem:[#allocation19 + $0xb4] ss:$8 sps:$4 sm:$0xff]   ;;  %v4217_v20 = vld [vmem:[#allocation19 + $0xb0] ss:$8 sps:$4 sm:$0xff]  }
 0x3d2   :  { %v4220_v21 = vld [vmem:[#allocation19 + $0xc0] ss:$8 sps:$4 sm:$0xff]   ;;  %v4222_v24 = vld [vmem:[#allocation19 + $0xc4] ss:$8 sps:$4 sm:$0xff]   ;;  %v4225_v26 = vld [vmem:[#allocation19 + $0xd4] ss:$8 sps:$4 sm:$0xff]  }
 0x3d3   :  { %1740 = vmatpush1.bf16.msra.mxu1 %v4139_v34  ;;  %v4223_v27 = vld [vmem:[#allocation19 + $0xd0] ss:$8 sps:$4 sm:$0xff]   ;;  %v4226_v34 = vld [vmem:[#allocation19 + $0xe0] ss:$8 sps:$4 sm:$0xff]  }
 0x3d4   :  { %1741 = vmatprep.subr.bf16.mxu1 %v4144_v36  ;;  %2113 = vmatpush1.bf16.msra.mxu0 %v4193_v4  ;;  %v4231_v36 = vld [vmem:[#allocation19 + $0xf4] ss:$8 sps:$4 sm:$0xff]  }
 0x3d5   :  { %2114 = vmatprep.subr.bf16.mxu0 %v4198_v5 }
 0x3d7   :  { %1742 = vmatpush1.bf16.msra.mxu1 %v4142_v37  ;;  %v4229_v37 = vld [vmem:[#allocation19 + $0xf0] ss:$8 sps:$4 sm:$0xff]  }
 0x3d8   :  { %1743 = vmatprep.subr.bf16.mxu1 %v4147_v38  ;;  %2115 = vmatpush1.bf16.msra.mxu0 %v4196_v50  ;;  %v4234_v38 = vld [vmem:[%s5651_s16 + $0x4] ss:$8 sps:$4 sm:$0xff]  }
 0x3d9   :  { %2116 = vmatprep.subr.bf16.mxu0 %v4201_v6 }
 0x3db   :  { %1744 = vmatpush1.bf16.msra.mxu1 %v4145_v39  ;;  %v1362_v39 = vld [vmem:[#allocation14] sm:$0x3] }
 0x3dc   :  { %1745 = vmatprep.subr.bf16.mxu1 %v4150_v40  ;;  %2117 = vmatpush1.bf16.msra.mxu0 %v4199_v7  ;;  %v1367_v40 = vrot.slane %v1362_v39, %v5386_v23 }
 0x3dd   :  { %2118 = vmatprep.subr.bf16.mxu0 %v4204_v8 }
 0x3df   :  { %1746 = vmatpush1.bf16.msra.mxu1 %v4148_v43  ;;  %v1371_v43 = vrot.slane %v1362_v39, %v5389_v25 }
 0x3e0   :  { %1747 = vmatprep.subr.bf16.mxu1 %v4153_v44  ;;  %2119 = vmatpush1.bf16.msra.mxu0 %v4202_v9 }
 0x3e1   :  { %2120 = vmatprep.subr.bf16.mxu0 %v4207_v10 }
 0x3e3   :  { %1748 = vmatpush1.bf16.msra.mxu1 %v4151_v46 }
 0x3e4   :  { %1749 = vmatprep.subr.bf16.mxu1 %v4156_v47  ;;  %2121 = vmatpush1.bf16.msra.mxu0 %v4205_v11 }
 0x3e5   :  { %2122 = vmatprep.subr.bf16.mxu0 %v4210_v12 }
 0x3e7   :  { %1750 = vmatpush1.bf16.msra.mxu1 %v4154_v48 }
 0x3e8   :  { %1751 = vmatprep.subr.bf16.mxu1 %v4159_v49  ;;  %2123 = vmatpush1.bf16.msra.mxu0 %v4208_v13 }
 0x3e9   :  { %2124 = vmatprep.subr.bf16.mxu0 %v4213_v14 }
 0x3eb   :  { %1752 = vmatpush1.bf16.msra.mxu1 %v4157_v31 }
 0x3ec   :  { %1753 = vmatprep.subr.bf16.mxu1 %v4162_v51  ;;  %2125 = vmatpush1.bf16.msra.mxu0 %v4211_v15 }
 0x3ed   :  { %2126 = vmatprep.subr.bf16.mxu0 %v4216_v16 }
 0x3ef   :  { %1754 = vmatpush1.bf16.msra.mxu1 %v4160_v29 }
 0x3f0   :  { %1755 = vmatprep.subr.bf16.mxu1 %v4165_v52  ;;  %2127 = vmatpush1.bf16.msra.mxu0 %v4214_v17 }
 0x3f1   :  { %2128 = vmatprep.subr.bf16.mxu0 %v4219_v18 }
 0x3f3   :  { %1756 = vmatpush1.bf16.msra.mxu1 %v4163_v54 }
 0x3f4   :  { %1757 = vmatprep.subr.bf16.mxu1 %v4168_v55  ;;  %2129 = vmatpush1.bf16.msra.mxu0 %v4217_v20 }
 0x3f5   :  { %2130 = vmatprep.subr.bf16.mxu0 %v4222_v24 }
 0x3f7   :  { %1758 = vmatpush1.bf16.msra.mxu1 %v4166_v56 }
 0x3f8   :  { %1759 = vmatprep.subr.bf16.mxu1 %v4171_v57  ;;  %2131 = vmatpush1.bf16.msra.mxu0 %v4220_v21 }
 0x3f9   :  { %2132 = vmatprep.subr.bf16.mxu0 %v4225_v26 }
 0x3fb   :  { %1760 = vmatpush1.bf16.msra.mxu1 %v4169_v58 }
 0x3fc   :  { %1761 = vmatprep.subr.bf16.mxu1 %v4174_v59  ;;  %2133 = vmatpush1.bf16.msra.mxu0 %v4223_v27 }
 0x3ff   :  { %1762 = vmatpush1.bf16.msra.mxu1 %v4172_v61 }
 0x400   :  { %1763 = vmatprep.subr.bf16.mxu1 %v4177_v63 }
 0x403   :  { %1764 = vmatpush1.bf16.msra.mxu1 %v4175_v2 }
 0x404   :  { %1765 = vmatprep.subr.bf16.mxu1 %v4180_v62 }
 0x407   :  { %1766 = vmatpush1.bf16.msra.mxu1 %v4178_v53 }
 0x408   :  { %1767 = vmatprep.subr.bf16.mxu1 %v4183_v60 }
 0x40b   :  { %1768 = vmatpush1.bf16.msra.mxu1 %v4181_v1 }
 0x40e   :  { %1770 = vmatmul.mubr.bf16.vlgmr.msra.gmra.mrb[8].mxu1 %v5500_v30  ;;  %v4228_v30 = vld [vmem:[#allocation19 + $0xe4] ss:$8 sps:$4 sm:$0xff]  }
 0x40f   :  { %2134 = vmatprep.subr.bf16.mxu0 %v4228_v30 }
 0x410   :  { %2135 = vmatpush1.bf16.msra.mxu0 %v4226_v34 }
 0x411   :  { %2136 = vmatprep.subr.bf16.mxu0 %v4231_v36 }
 0x414   :  { %2137 = vmatpush1.bf16.msra.mxu0 %v4229_v37 }
 0x415   :  { %2270 = vmatprep.subr.bf16.mxu0 %v4234_v38  ;;  %v1820_v38 = vld [vmem:[#allocation16] sm:$0x3] }
 0x4e1   :  { %v1771_v44 = vpop.f32.mrb[8].mxu1 }
 0x4e2   :  { %v5508_v46 = vadd.f32 %v1771_v44, %v1367_v40  ;;  %v1773_v47 = vpop.f32.mrb[9].mxu1 }
 0x4e3   :  { %v3924_v48 = vadd.f32 %v1773_v47, %v1371_v43  ;;  %v1775_v49 = vpop.f32.mrb[10].mxu1 }
 0x4e4   :  { %v3925_v31 = vadd.f32 %v1775_v49, %v1367_v40  ;;  %v1777_v51 = vpop.f32.mrb[11].mxu1  ;;  %v1796_v52 = vmul.f32 %v5508_v46, %v5508_v46 }
 0x4e5   :  { %v3926_v29 = vadd.f32 %v1777_v51, %v1371_v43  ;;  %v1797_v56 = vmul.f32 %v3924_v48, %v3924_v48 }
 0x4e6   :  { %v1780_v54 = vadd.f32 %v3925_v31, %v5508_v46  ;;  %v1798_v55 = vmul.f32 %v3925_v31, %v3925_v31 }
 0x4e7   :  { %v1787_v57 = vadd.f32 %v3926_v29, %v3924_v48  ;;  %v1799_v58 = vmul.f32 %v3926_v29, %v3926_v29 }
 0x4e8   :  { %v1781_v59 = vrot.slane %v1780_v54, 4  ;;  %v1800_v61 = vadd.f32 %v1798_v55, %v1796_v52 }
 0x4e9   :  { %v1788_v63 = vrot.slane %v1787_v57, 4  ;;  %v1807_v2 = vadd.f32 %v1799_v58, %v1797_v56  ;;  %v1844_v58 = vld [vmem:[#allocation17] sm:$0x3] }
 0x4ea   :  { %v1782_v62 = vadd.f32 %v1781_v59, %v1780_v54  ;;  %v1801_v53 = vrot.slane %v1800_v61, 4 }
 0x4eb   :  { %v1789_v60 = vadd.f32 %v1788_v63, %v1787_v57  ;;  %v1808_v1 = vrot.slane %v1807_v2, 4 }
 0x4ec   :  { %v1783_v45 = vrot.slane %v1782_v62, 2  ;;  %v1802_v33 = vadd.f32 %v1801_v53, %v1800_v61 }
 0x4ed   :  { %v1790_v3 = vrot.slane %v1789_v60, 2  ;;  %v1809_v41 = vadd.f32 %v1808_v1, %v1807_v2 }
 0x4ee   :  { %v1784_v35 = vadd.f32 %v1783_v45, %v1782_v62  ;;  %v1803_v22 = vrot.slane %v1802_v33, 2 }
 0x4ef   :  { %v1791_v42 = vadd.f32 %v1790_v3, %v1789_v60  ;;  %v1810_v4 = vrot.slane %v1809_v41, 2  ;;  %v4232_v3 = vld [vmem:[%s5651_s16] ss:$8 sps:$4 sm:$0xff]  }
 0x4f0   :  { %v1785_v5 = vrot.slane %v1784_v35, 1  ;;  %v1804_v50 = vadd.f32 %v1803_v22, %v1802_v33  ;;  %v4238_v22 = vld [vmem:[%s5651_s16 + $0x20] ss:$8 sps:$4 sm:$0xff]  }
 0x4f1   :  { %v1792_v6 = vrot.slane %v1791_v42, 1  ;;  %v1811_v7 = vadd.f32 %v1810_v4, %v1809_v41  ;;  %v4235_v41 = vld [vmem:[%s5651_s16 + $0x10] ss:$8 sps:$4 sm:$0xff]   ;;  %v4244_v4 = vld [vmem:[%s5651_s16 + $0x40] ss:$8 sps:$4 sm:$0xff]  }
 0x4f2   :  { %v1786_v8 = vadd.f32 %v1785_v5, %v1784_v35  ;;  %v1805_v9 = vrot.slane %v1804_v50, 1  ;;  %v4240_v35 = vld [vmem:[%s5651_s16 + $0x24] ss:$8 sps:$4 sm:$0xff]  }
 0x4f3   :  { %v1793_v10 = vadd.f32 %v1792_v6, %v1791_v42  ;;  %v1812_v11 = vrot.slane %v1811_v7, 1  ;;  %v4243_v42 = vld [vmem:[%s5651_s16 + $0x34] ss:$8 sps:$4 sm:$0xff]   ;;  %v4246_v5 = vld [vmem:[%s5651_s16 + $0x44] ss:$8 sps:$4 sm:$0xff]  }
 0x4f4   :  { %v1794_v12 = vmul.f32 0.0625, %v1786_v8  ;;  %v1806_v13 = vadd.f32 %v1805_v9, %v1804_v50  ;;  %v4249_v50 = vld [vmem:[%s5651_s16 + $0x54] ss:$8 sps:$4 sm:$0xff]   ;;  %v4247_v6 = vld [vmem:[%s5651_s16 + $0x50] ss:$8 sps:$4 sm:$0xff]  }
 0x4f5   :  { %v1795_v14 = vmul.f32 0.0625, %v1793_v10  ;;  %v1813_v15 = vadd.f32 %v1812_v11, %v1811_v7  ;;  %v4252_v7 = vld [vmem:[%s5651_s16 + $0x64] ss:$8 sps:$4 sm:$0xff]   ;;  %v4250_v8 = vld [vmem:[%s5651_s16 + $0x60] ss:$8 sps:$4 sm:$0xff]  }
 0x4f6   :  { %v1814_v16 = vmul.f32 0.0625, %v1806_v13  ;;  %v1816_v17 = vmul.f32 %v1794_v12, %v1794_v12  ;;  %v4255_v9 = vld [vmem:[%s5651_s16 + $0x74] ss:$8 sps:$4 sm:$0xff]   ;;  %v4253_v10 = vld [vmem:[%s5651_s16 + $0x70] ss:$8 sps:$4 sm:$0xff]  }
 0x4f7   :  { %v1815_v18 = vmul.f32 0.0625, %v1813_v15  ;;  %v1817_v20 = vmul.f32 %v1795_v14, %v1795_v14  ;;  %v4258_v11 = vld [vmem:[#allocation23 + $0x4] ss:$16 sps:$4 sm:$0xff]   ;;  %v4261_v13 = vld [vmem:[#allocation23 + $0xc] ss:$16 sps:$4 sm:$0xff]  }
 0x4f8   :  { %v1818_v21 = vsub.f32 %v1814_v16, %v1816_v17  ;;  %2768 = vmatprep.subr.bf16.mxu1 %v4261_v13  ;;  %v4265_v15 = vld [vmem:[#allocation23 + $0x28] ss:$16 sps:$4 sm:$0xff]   ;;  %v4273_v16 = vld [vmem:[#allocation23 + $0x4c] ss:$16 sps:$4 sm:$0xff]   ;;  %v4288_v13 = vld [vmem:[#allocation23 + $0xa4] ss:$16 sps:$4 sm:$0xff]  }
 0x4f9   :  { %v1819_v24 = vsub.f32 %v1815_v18, %v1817_v20  ;;  %v4271_v17 = vld [vmem:[#allocation23 + $0x48] ss:$16 sps:$4 sm:$0xff]   ;;  %v4279_v18 = vld [vmem:[#allocation23 + $0x6c] ss:$16 sps:$4 sm:$0xff]  }
 0x4fa   :  { %v1821_v26 = vadd.f32 1e-05, %v1818_v21  ;;  %v4277_v20 = vld [vmem:[#allocation23 + $0x68] ss:$16 sps:$4 sm:$0xff]   ;;  %v4285_v21 = vld [vmem:[#allocation23 + $0x8c] ss:$16 sps:$4 sm:$0xff]  }
 0x4fb   :  { %v1822_v27 = vadd.f32 1e-05, %v1819_v24  ;;  %v4283_v24 = vld [vmem:[#allocation23 + $0x88] ss:$16 sps:$4 sm:$0xff]  }
 0x4fc   :  { %4476 = vrsqrt.f32 %v1821_v26  ;;  %v4291_v26 = vld [vmem:[#allocation23 + $0xac] ss:$16 sps:$4 sm:$0xff]  }
 0x4fd   :  { %4478 = vrsqrt.f32 %v1822_v27  ;;  %v4289_v27 = vld [vmem:[#allocation23 + $0xa8] ss:$16 sps:$4 sm:$0xff]  }
 0x506   :  { %v4477_v30 = vpop.eup %4476 }
 0x507   :  { %v4479_v34 = vpop.eup %4478 }
 0x508   :  { %v1827_v36 = vcombine.low %v4477_v30, %v4479_v34  ;;  %v4297_v30 = vld [vmem:[#allocation23 + $0xcc] ss:$16 sps:$4 sm:$0xff]   ;;  %v4295_v34 = vld [vmem:[#allocation23 + $0xc8] ss:$16 sps:$4 sm:$0xff]  }
 0x50a   :  { %v1834_v37 = vrot.slane %v1827_v36, %v5409_v19  ;;  %v4303_v36 = vld [vmem:[#allocation23 + $0xec] ss:$16 sps:$4 sm:$0xff]  }
 0x50c   :  { %v1841_v39 = vrot.slane %v1834_v37, %v5409_v19  ;;  %v4301_v37 = vld [vmem:[#allocation23 + $0xe8] ss:$16 sps:$4 sm:$0xff]  }
 0x50e   :  { %v1843_v40 = vmul.f32 %v1841_v39, %v1820_v38  ;;  %v4309_v38 = vld [vmem:[#allocation23 + $0x10c] ss:$16 sps:$4 sm:$0xff]   ;;  %v4307_v39 = vld [vmem:[#allocation23 + $0x108] ss:$16 sps:$4 sm:$0xff]  }
 0x510   :  { %v1849_v43 = vrot.slane %v1843_v40, %v5386_v23  ;;  %v1853_v44 = vrot.slane %v1843_v40, %v5389_v25  ;;  %v4315_v40 = vld [vmem:[#allocation23 + $0x12c] ss:$16 sps:$4 sm:$0xff]  }
 0x512   :  { %v1856_v47 = vmul.f32 %v1849_v43, %v1794_v12  ;;  %v1857_v49 = vmul.f32 %v1853_v44, %v1795_v14  ;;  %v1880_v51 = vmul.f32 %v3926_v29, %v1853_v44  ;;  %v1878_v52 = vmul.f32 %v3924_v48, %v1853_v44  ;;  %v4259_v12 = vld [vmem:[#allocation23 + $0x8] ss:$16 sps:$4 sm:$0xff]   ;;  %v4267_v14 = vld [vmem:[#allocation23 + $0x2c] ss:$16 sps:$4 sm:$0xff]  }
 0x513   :  { %v1877_v54 = vmul.f32 %v5508_v46, %v1849_v43  ;;  %v1879_v55 = vmul.f32 %v3925_v31, %v1849_v43  ;;  %2769 = vmatpush1.bf16.msra.mxu1 %v4259_v12  ;;  %v4313_v43 = vld [vmem:[#allocation23 + $0x128] ss:$16 sps:$4 sm:$0xff]   ;;  %v4321_v44 = vld [vmem:[#allocation23 + $0x14c] ss:$16 sps:$4 sm:$0xff]   ;;  %v4280_v12 = vld [vmem:[#allocation23 + $0x80] ss:$16 sps:$4 sm:$0xff]  }
 0x514   :  { %v1860_v56 = vcombine.low %v1856_v47, %v1857_v49  ;;  %2770 = vmatprep.subr.bf16.mxu1 %v4267_v14  ;;  %v4319_v47 = vld [vmem:[#allocation23 + $0x148] ss:$16 sps:$4 sm:$0xff]   ;;  %v4327_v49 = vld [vmem:[#allocation23 + $0x16c] ss:$16 sps:$4 sm:$0xff]   ;;  %v4286_v14 = vld [vmem:[#allocation23 + $0xa0] ss:$16 sps:$4 sm:$0xff]  }
 0x516   :  { %v1867_v57 = vrot.slane %v1860_v56, %v5409_v19  ;;  %v4337_v56 = vld [vmem:[#allocation23 + $0x1a8] ss:$16 sps:$4 sm:$0xff]  }
 0x517   :  { %2771 = vmatpush1.bf16.msra.mxu1 %v4265_v15  ;;  %v4294_v15 = vld [vmem:[#allocation23 + $0xc4] ss:$16 sps:$4 sm:$0xff]  }
 0x518   :  { %v1874_v59 = vrot.slane %v1867_v57, %v5409_v19  ;;  %v4237_v19 = vld [vmem:[%s5651_s16 + $0x14] ss:$8 sps:$4 sm:$0xff]   ;;  %2772 = vmatprep.subr.bf16.mxu1 %v4273_v16  ;;  %v1934_v57 = vld [vmem:[#allocation20] sm:$0x3] }
 0x519   :  { %v4292_v16 = vld [vmem:[#allocation23 + $0xc0] ss:$16 sps:$4 sm:$0xff]  }
 0x51a   :  { %v1876_v61 = vsub.f32 %v1844_v58, %v1874_v59  ;;  %v1939_v58 = vrot.slane %v1934_v57, %v5386_v23  ;;  %v1943_v59 = vrot.slane %v1934_v57, %v5389_v25  ;;  %v2178_v57 = vld [vmem:[#allocation22] sm:$0x3] }
 0x51b   :  { %2773 = vmatpush1.bf16.msra.mxu1 %v4271_v17  ;;  %v4300_v17 = vld [vmem:[#allocation23 + $0xe4] ss:$16 sps:$4 sm:$0xff]  }
 0x51c   :  { %v1889_v63 = vrot.slane %v1876_v61, %v5389_v25  ;;  %v1885_v2 = vrot.slane %v1876_v61, %v5386_v23  ;;  %2774 = vmatprep.subr.bf16.mxu1 %v4279_v18  ;;  %v4298_v18 = vld [vmem:[#allocation23 + $0xe0] ss:$16 sps:$4 sm:$0xff]  }
 0x51e   :  { %v1893_v62 = vadd.f32 %v1889_v63, %v1878_v52  ;;  %v1895_v53 = vadd.f32 %v1889_v63, %v1880_v51  ;;  %v1892_v60 = vadd.f32 %v1885_v2, %v1877_v54  ;;  %v1894_v1 = vadd.f32 %v1885_v2, %v1879_v55  ;;  %v4325_v51 = vld [vmem:[#allocation23 + $0x168] ss:$16 sps:$4 sm:$0xff]   ;;  %v4333_v52 = vld [vmem:[#allocation23 + $0x18c] ss:$16 sps:$4 sm:$0xff]  }
 0x51f   :  { %2775 = vmatpush1.bf16.msra.mxu1 %v4277_v20  ;;  %v4331_v54 = vld [vmem:[#allocation23 + $0x188] ss:$16 sps:$4 sm:$0xff]   ;;  %v4339_v55 = vld [vmem:[#allocation23 + $0x1ac] ss:$16 sps:$4 sm:$0xff]   ;;  %v4306_v20 = vld [vmem:[#allocation23 + $0x104] ss:$16 sps:$4 sm:$0xff]  }
 0x520   :  { %v1897_v29 = vmax.f32 %v1893_v62, 0.0  ;;  %v1899_v48 = vmax.f32 %v1895_v53, 0.0  ;;  %v1896_v45 = vmax.f32 %v1892_v60, 0.0  ;;  %v1898_v46 = vmax.f32 %v1894_v1, 0.0  ;;  %2776 = vmatprep.subr.bf16.mxu1 %v4285_v21  ;;  %v4304_v21 = vld [vmem:[#allocation23 + $0x100] ss:$16 sps:$4 sm:$0xff]  }
 0x522   :  { %v1901_v31 = vpack.c.bf16 %v1899_v48, %v1897_v29  ;;  %v1900_v33 = vpack.c.bf16 %v1898_v46, %v1896_v45 }
 0x523   :  { %2777 = vmatpush1.bf16.msra.mxu1 %v4283_v24  ;;  %v4312_v24 = vld [vmem:[#allocation23 + $0x124] ss:$16 sps:$4 sm:$0xff]  }
 0x524   :  { %2138 = vmatprep.mubr.bf16.mxu0 %v1901_v31  ;;  %2778 = vmatprep.subr.bf16.mxu1 %v4291_v26  ;;  %v4310_v26 = vld [vmem:[#allocation23 + $0x120] ss:$16 sps:$4 sm:$0xff]  }
 0x525   :  { %2139 = vmatmul.mubr.bf16.vlgmr.msra.gmra.mrb[4].mxu0 %v1900_v33  ;;  %v2155_v33 = vld [vmem:[%s5694_s24] sm:$0xff] }
 0x526   :  { %2271 = vmatpush1.bf16.msra.mxu0 %v4232_v3  ;;  %2302 = vmatprep.mubr.bf16.mxu0 %v5002_v0  ;;  %v4241_v0 = vld [vmem:[%s5651_s16 + $0x30] ss:$8 sps:$4 sm:$0xff]  }
 0x527   :  { %2272 = vmatprep.subr.bf16.mxu0 %v4237_v19  ;;  %2779 = vmatpush1.bf16.msra.mxu1 %v4289_v27  ;;  %v2156_v19 = vld [vmem:[%s5694_s24 + $0x8] sm:$0xff] }
 0x528   :  { %2780 = vmatprep.subr.bf16.mxu1 %v4297_v30  ;;  %v4318_v27 = vld [vmem:[#allocation23 + $0x144] ss:$16 sps:$4 sm:$0xff]   ;;  %v4316_v30 = vld [vmem:[#allocation23 + $0x140] ss:$16 sps:$4 sm:$0xff]  }
 0x52a   :  { %2273 = vmatpush1.bf16.msra.mxu0 %v4235_v41 }
 0x52b   :  { %2274 = vmatprep.subr.bf16.mxu0 %v4240_v35  ;;  %2781 = vmatpush1.bf16.msra.mxu1 %v4295_v34  ;;  %v4324_v34 = vld [vmem:[#allocation23 + $0x164] ss:$16 sps:$4 sm:$0xff]  }
 0x52c   :  { %2782 = vmatprep.subr.bf16.mxu1 %v4303_v36  ;;  %v4322_v36 = vld [vmem:[#allocation23 + $0x160] ss:$16 sps:$4 sm:$0xff]  }
 0x52e   :  { %2275 = vmatpush1.bf16.msra.mxu0 %v4238_v22 }
 0x52f   :  { %2276 = vmatprep.subr.bf16.mxu0 %v4243_v42  ;;  %2783 = vmatpush1.bf16.msra.mxu1 %v4301_v37  ;;  %v4330_v37 = vld [vmem:[#allocation23 + $0x184] ss:$16 sps:$4 sm:$0xff]  }
 0x530   :  { %2784 = vmatprep.subr.bf16.mxu1 %v4309_v38  ;;  %v4328_v38 = vld [vmem:[#allocation23 + $0x180] ss:$16 sps:$4 sm:$0xff]  }
 0x532   :  { %2277 = vmatpush1.bf16.msra.mxu0 %v4241_v0 }
 0x533   :  { %2278 = vmatprep.subr.bf16.mxu0 %v4246_v5  ;;  %2785 = vmatpush1.bf16.msra.mxu1 %v4307_v39  ;;  %v4336_v39 = vld [vmem:[#allocation23 + $0x1a4] ss:$16 sps:$4 sm:$0xff]  }
 0x534   :  { %2786 = vmatprep.subr.bf16.mxu1 %v4315_v40  ;;  %v4334_v40 = vld [vmem:[#allocation23 + $0x1a0] ss:$16 sps:$4 sm:$0xff]  }
 0x536   :  { %2279 = vmatpush1.bf16.msra.mxu0 %v4244_v4  ;;  %v4256_v4 = vld [vmem:[#allocation23] ss:$16 sps:$4 sm:$0xff]  }
 0x537   :  { %2280 = vmatprep.subr.bf16.mxu0 %v4249_v50  ;;  %2787 = vmatpush1.bf16.msra.mxu1 %v4313_v43  ;;  %v4264_v50 = vld [vmem:[#allocation23 + $0x24] ss:$16 sps:$4 sm:$0xff]  }
 0x538   :  { %2788 = vmatprep.subr.bf16.mxu1 %v4321_v44  ;;  %v4342_v43 = vld [vmem:[#allocation23 + $0x1c4] ss:$16 sps:$4 sm:$0xff]   ;;  %v4345_v44 = vld [vmem:[#allocation23 + $0x1cc] ss:$16 sps:$4 sm:$0xff]  }
 0x53a   :  { %2281 = vmatpush1.bf16.msra.mxu0 %v4247_v6  ;;  %v4262_v6 = vld [vmem:[#allocation23 + $0x20] ss:$16 sps:$4 sm:$0xff]  }
 0x53b   :  { %2282 = vmatprep.subr.bf16.mxu0 %v4252_v7  ;;  %2789 = vmatpush1.bf16.msra.mxu1 %v4319_v47  ;;  %v4270_v7 = vld [vmem:[#allocation23 + $0x44] ss:$16 sps:$4 sm:$0xff]   ;;  %v4340_v47 = vld [vmem:[#allocation23 + $0x1c0] ss:$16 sps:$4 sm:$0xff]  }
 0x53c   :  { %2790 = vmatprep.subr.bf16.mxu1 %v4327_v49  ;;  %v4343_v49 = vld [vmem:[#allocation23 + $0x1c8] ss:$16 sps:$4 sm:$0xff]  }
 0x53e   :  { %2283 = vmatpush1.bf16.msra.mxu0 %v4250_v8  ;;  %v4268_v8 = vld [vmem:[#allocation23 + $0x40] ss:$16 sps:$4 sm:$0xff]  }
 0x53f   :  { %2284 = vmatprep.subr.bf16.mxu0 %v4255_v9  ;;  %2791 = vmatpush1.bf16.msra.mxu1 %v4325_v51  ;;  %v4276_v9 = vld [vmem:[#allocation23 + $0x64] ss:$16 sps:$4 sm:$0xff]  }
 0x540   :  { %2792 = vmatprep.subr.bf16.mxu1 %v4333_v52  ;;  %v4348_v51 = vld [vmem:[#allocation23 + $0x1e4] ss:$16 sps:$4 sm:$0xff]   ;;  %v4351_v52 = vld [vmem:[#allocation23 + $0x1ec] ss:$16 sps:$4 sm:$0xff]  }
 0x542   :  { %2285 = vmatpush1.bf16.msra.mxu0 %v4253_v10  ;;  %v4274_v10 = vld [vmem:[#allocation23 + $0x60] ss:$16 sps:$4 sm:$0xff]  }
 0x543   :  { %2725 = vmatprep.subr.bf16.mxu0 %v4258_v11  ;;  %2793 = vmatpush1.bf16.msra.mxu1 %v4331_v54  ;;  %v4282_v11 = vld [vmem:[#allocation23 + $0x84] ss:$16 sps:$4 sm:$0xff]   ;;  %v4346_v54 = vld [vmem:[#allocation23 + $0x1e0] ss:$16 sps:$4 sm:$0xff]  }
 0x544   :  { %2794 = vmatprep.subr.bf16.mxu1 %v4339_v55  ;;  %v4349_v55 = vld [vmem:[#allocation23 + $0x1e8] ss:$16 sps:$4 sm:$0xff]  }
 0x547   :  { %2795 = vmatpush1.bf16.msra.mxu1 %v4337_v56  ;;  %v4354_v56 = vld [vmem:[#allocation26 + $0x4] ss:$8 sps:$4 sm:$0xff]  }
 0x548   :  { %2796 = vmatprep.subr.bf16.mxu1 %v4345_v44  ;;  %v4451_v44 = vld [vmem:[#allocation29 + $0x8] sm:$0xff]  }
 0x54b   :  { %2797 = vmatpush1.bf16.msra.mxu1 %v4343_v49  ;;  %v4453_v49 = vld [vmem:[#allocation29 + $0x10] sm:$0xff]  }
 0x54c   :  { %2798 = vmatprep.subr.bf16.mxu1 %v4351_v52  ;;  %v4455_v52 = vld [vmem:[#allocation29 + $0x18] sm:$0xff]  }
 0x54f   :  { %2799 = vmatpush1.bf16.msra.mxu1 %v4349_v55  ;;  %v4457_v55 = vld [vmem:[#allocation29 + $0x20] sm:$0xff]  }
 0x5f8   :  { %v2140_v61 = vpop.f32.mrb[4].mxu0 }
 0x5f9   :  { %v2141_v63 = vadd.f32 %v2140_v61, %v1939_v58  ;;  %v2142_v2 = vpop.f32.mrb[5].mxu0 }
 0x5fa   :  { %v2143_v62 = vadd.f32 %v2142_v2, %v1943_v59  ;;  %v2144_v53 = vpop.f32.mrb[6].mxu0 }
 0x5fb   :  { %3501 = vst [vmem:[#allocation32] sm:$0xff] %v2141_v63  ;;  %v2145_v60 = vadd.f32 %v2144_v53, %v1939_v58  ;;  %v2146_v1 = vpop.f32.mrb[7].mxu0  ;;  %v2183_v58 = vrot.slane %v2178_v57, %v5386_v23 }
 0x5fc   :  { %v2149_v29 = vmul.f32 0.5, %v2143_v62  ;;  %3503 = vst [vmem:[#allocation34] sm:$0xff] %v2143_v62  ;;  %v2147_v48 = vadd.f32 %v2146_v1, %v1943_v59  ;;  %v2187_v59 = vrot.slane %v2178_v57, %v5389_v25  ;;  %v2383_v57 = vld [vmem:[#allocation25] sm:$0xf] }
 0x5fd   :  { %3502 = vst [vmem:[#allocation32 + $0x8] sm:$0xff] %v2145_v60 }
 0x5fe   :  { %v2151_v45 = vmul.f32 1.442695, %v2149_v29  ;;  %v2150_v46 = vmul.f32 0.5, %v2147_v48  ;;  %3504 = vst [vmem:[#allocation34 + $0x8] sm:$0xff] %v2147_v48 }
 0x600   :  { %4480 = vpow2.f32 %v2151_v45  ;;  %v2153_v31 = vmul.f32 1.442695, %v2150_v46 }
 0x602   :  { %4482 = vpow2.f32 %v2153_v31 }
 0x60a   :  { %v4481_v3 = vpop.eup %4480 }
 0x60b   :  { %v2157_v41 = vmul.f32 %v4481_v3, %v2155_v33 }
 0x60c   :  { %v4483_v35 = vpop.eup %4482 }
 0x60d   :  { %v2158_v22 = vmul.f32 %v4483_v35, %v2156_v19  ;;  %v2159_v42 = vadd.f32 %v2157_v41, %v2141_v63  ;;  %v4352_v19 = vld [vmem:[#allocation26] ss:$8 sps:$4 sm:$0xff]   ;;  %v4357_v41 = vld [vmem:[#allocation26 + $0x14] ss:$8 sps:$4 sm:$0xff]   ;;  %v4355_v35 = vld [vmem:[#allocation26 + $0x10] ss:$8 sps:$4 sm:$0xff]  }
 0x60f   :  { %v2160_v0 = vadd.f32 %v2158_v22, %v2145_v60  ;;  %v4360_v22 = vld [vmem:[#allocation26 + $0x24] ss:$8 sps:$4 sm:$0xff]  }
 0x611   :  { %v2161_v5 = vpack.c.bf16 %v2160_v0, %v2159_v42  ;;  %v4358_v42 = vld [vmem:[#allocation26 + $0x20] ss:$8 sps:$4 sm:$0xff]   ;;  %v4363_v0 = vld [vmem:[#allocation26 + $0x34] ss:$8 sps:$4 sm:$0xff]  }
 0x613   :  { %2303 = vmatmul.mubr.bf16.vlgmr.msra.gmra.mrb[8].mxu0 %v2161_v5  ;;  %v4366_v5 = vld [vmem:[#allocation26 + $0x44] ss:$8 sps:$4 sm:$0xff]  }
 0x614   :  { %2726 = vmatpush1.bf16.msra.mxu0 %v4256_v4  ;;  %v4361_v4 = vld [vmem:[#allocation26 + $0x30] ss:$8 sps:$4 sm:$0xff]  }
 0x615   :  { %2727 = vmatprep.subr.bf16.mxu0 %v4264_v50  ;;  %v4364_v50 = vld [vmem:[#allocation26 + $0x40] ss:$8 sps:$4 sm:$0xff]  }
 0x618   :  { %2728 = vmatpush1.bf16.msra.mxu0 %v4262_v6  ;;  %v4369_v6 = vld [vmem:[#allocation26 + $0x54] ss:$8 sps:$4 sm:$0xff]  }
 0x619   :  { %2729 = vmatprep.subr.bf16.mxu0 %v4270_v7  ;;  %v4367_v7 = vld [vmem:[#allocation26 + $0x50] ss:$8 sps:$4 sm:$0xff]  }
 0x61c   :  { %2730 = vmatpush1.bf16.msra.mxu0 %v4268_v8  ;;  %v4372_v8 = vld [vmem:[#allocation26 + $0x64] ss:$8 sps:$4 sm:$0xff]  }
 0x61d   :  { %2731 = vmatprep.subr.bf16.mxu0 %v4276_v9  ;;  %v4370_v9 = vld [vmem:[#allocation26 + $0x60] ss:$8 sps:$4 sm:$0xff]  }
 0x620   :  { %2732 = vmatpush1.bf16.msra.mxu0 %v4274_v10  ;;  %v4375_v10 = vld [vmem:[#allocation26 + $0x74] ss:$8 sps:$4 sm:$0xff]  }
 0x621   :  { %2733 = vmatprep.subr.bf16.mxu0 %v4282_v11  ;;  %v4373_v11 = vld [vmem:[#allocation26 + $0x70] ss:$8 sps:$4 sm:$0xff]  }
 0x624   :  { %2734 = vmatpush1.bf16.msra.mxu0 %v4280_v12  ;;  %v4378_v12 = vld [vmem:[#allocation26 + $0x84] ss:$8 sps:$4 sm:$0xff]  }
 0x625   :  { %2735 = vmatprep.subr.bf16.mxu0 %v4288_v13  ;;  %v4376_v13 = vld [vmem:[#allocation26 + $0x80] ss:$8 sps:$4 sm:$0xff]  }
 0x628   :  { %2736 = vmatpush1.bf16.msra.mxu0 %v4286_v14  ;;  %v4381_v14 = vld [vmem:[#allocation26 + $0x94] ss:$8 sps:$4 sm:$0xff]  }
 0x629   :  { %2737 = vmatprep.subr.bf16.mxu0 %v4294_v15  ;;  %v4379_v15 = vld [vmem:[#allocation26 + $0x90] ss:$8 sps:$4 sm:$0xff]  }
 0x62c   :  { %2738 = vmatpush1.bf16.msra.mxu0 %v4292_v16  ;;  %v4384_v16 = vld [vmem:[#allocation26 + $0xa4] ss:$8 sps:$4 sm:$0xff]  }
 0x62d   :  { %2739 = vmatprep.subr.bf16.mxu0 %v4300_v17  ;;  %v4382_v17 = vld [vmem:[#allocation26 + $0xa0] ss:$8 sps:$4 sm:$0xff]  }
 0x630   :  { %2740 = vmatpush1.bf16.msra.mxu0 %v4298_v18  ;;  %v4387_v18 = vld [vmem:[#allocation26 + $0xb4] ss:$8 sps:$4 sm:$0xff]  }
 0x631   :  { %2741 = vmatprep.subr.bf16.mxu0 %v4306_v20  ;;  %v4385_v20 = vld [vmem:[#allocation26 + $0xb0] ss:$8 sps:$4 sm:$0xff]  }
 0x634   :  { %2742 = vmatpush1.bf16.msra.mxu0 %v4304_v21  ;;  %v4390_v21 = vld [vmem:[#allocation26 + $0xc4] ss:$8 sps:$4 sm:$0xff]  }
 0x635   :  { %2743 = vmatprep.subr.bf16.mxu0 %v4312_v24  ;;  %v4388_v24 = vld [vmem:[#allocation26 + $0xc0] ss:$8 sps:$4 sm:$0xff]  }
 0x638   :  { %2744 = vmatpush1.bf16.msra.mxu0 %v4310_v26  ;;  %v4393_v26 = vld [vmem:[#allocation26 + $0xd4] ss:$8 sps:$4 sm:$0xff]  }
 0x639   :  { %2745 = vmatprep.subr.bf16.mxu0 %v4318_v27  ;;  %v4391_v27 = vld [vmem:[#allocation26 + $0xd0] ss:$8 sps:$4 sm:$0xff]  }
 0x63c   :  { %2746 = vmatpush1.bf16.msra.mxu0 %v4316_v30  ;;  %v4396_v30 = vld [vmem:[#allocation26 + $0xe4] ss:$8 sps:$4 sm:$0xff]  }
 0x63d   :  { %2747 = vmatprep.subr.bf16.mxu0 %v4324_v34  ;;  %v4394_v34 = vld [vmem:[#allocation26 + $0xe0] ss:$8 sps:$4 sm:$0xff]  }
 0x640   :  { %2748 = vmatpush1.bf16.msra.mxu0 %v4322_v36  ;;  %v4399_v36 = vld [vmem:[#allocation26 + $0xf4] ss:$8 sps:$4 sm:$0xff]  }
 0x641   :  { %2749 = vmatprep.subr.bf16.mxu0 %v4330_v37  ;;  %v4397_v37 = vld [vmem:[#allocation26 + $0xf0] ss:$8 sps:$4 sm:$0xff]  }
 0x644   :  { %2750 = vmatpush1.bf16.msra.mxu0 %v4328_v38  ;;  %v4402_v38 = vld [vmem:[#allocation26 + $0x104] ss:$8 sps:$4 sm:$0xff]  }
 0x645   :  { %2751 = vmatprep.subr.bf16.mxu0 %v4336_v39  ;;  %v4448_v39 = vld [vmem:[#allocation29 + $0x40] sm:$0xff]  }
 0x646   :  { %3901 = vmatprep.subr.bf16.mxu1 %v4448_v39  ;;  %v4427_v39 = vld [vmem:[#allocation26 + $0x190] ss:$8 sps:$4 sm:$0xff]  }
 0x648   :  { %2752 = vmatpush1.bf16.msra.mxu0 %v4334_v40  ;;  %v4449_v40 = vld [vmem:[#allocation29] sm:$0xff]  }
 0x649   :  { %2753 = vmatprep.subr.bf16.mxu0 %v4342_v43  ;;  %v4450_v43 = vld [vmem:[#allocation29 + $0x48] sm:$0xff]  }
 0x64c   :  { %2754 = vmatpush1.bf16.msra.mxu0 %v4340_v47  ;;  %v4452_v47 = vld [vmem:[#allocation29 + $0x50] sm:$0xff]  }
 0x64d   :  { %2755 = vmatprep.subr.bf16.mxu0 %v4348_v51  ;;  %v4454_v51 = vld [vmem:[#allocation29 + $0x58] sm:$0xff]  }
 0x650   :  { %2756 = vmatpush1.bf16.msra.mxu0 %v4346_v54  ;;  %v4456_v54 = vld [vmem:[#allocation29 + $0x60] sm:$0xff]  }
 0x651   :  { %3219 = vmatprep.subr.bf16.mxu0 %v4354_v56  ;;  %v4458_v56 = vld [vmem:[#allocation29 + $0x68] sm:$0xff]  }
 0x6e6   :  { %v2304_v61 = vpop.f32.mrb[8].mxu0 }
 0x6e7   :  { %v2305_v63 = vadd.f32 %v2304_v61, %v2183_v58  ;;  %v2306_v2 = vpop.f32.mrb[9].mxu0  ;;  %v2392_v61 = vrot.slane %v2383_v57, %v5389_v25 }
 0x6e8   :  { %v2307_v62 = vadd.f32 %v2306_v2, %v2187_v59  ;;  %v2308_v53 = vpop.f32.mrb[10].mxu0 }
 0x6e9   :  { %v2309_v60 = vadd.f32 %v2308_v53, %v2183_v58  ;;  %v2310_v1 = vpop.f32.mrb[11].mxu0  ;;  %v2313_v48 = vmax.f32 %v2305_v63, 0.0  ;;  %v2388_v58 = vrot.slane %v2383_v57, %v5386_v23  ;;  %v2400_v63 = vrot.slane %v2383_v57, %v5429_v32 }
 0x6ea   :  { %v2311_v29 = vadd.f32 %v2310_v1, %v2187_v59  ;;  %v2314_v46 = vmax.f32 %v2307_v62, 0.0  ;;  %v2396_v59 = vrot.slane %v2383_v57, %v5423_v28  ;;  %v4447_v57 = vld [vmem:[#allocation26 + $0x1f4] ss:$8 sps:$4 sm:$0xff]  }
 0x6eb   :  { %v2315_v45 = vmax.f32 %v2309_v60, 0.0 }
 0x6ec   :  { %v2316_v31 = vmax.f32 %v2311_v29, 0.0 }
 0x6ed   :  { %v2317_v33 = vpack.c.bf16 %v2315_v45, %v2313_v48 }
 0x6ee   :  { %v2318_v3 = vpack.c.bf16 %v2316_v31, %v2314_v46 }
 0x6f0   :  { %2757 = vmatprep.mubr.bf16.mxu0 %v2318_v3  ;;  %2800 = vmatprep.mubr.bf16.mxu1 %v2318_v3 }
 0x6f1   :  { %2758 = vmatmul.mubr.bf16.vlgmr.msra.gmra.mrb[12].mxu0 %v2317_v33  ;;  %2801 = vmatmul.mubr.bf16.vlgmr.msra.gmra.mrb[12].mxu1 %v2317_v33 }
 0x6f2   :  { %3220 = vmatpush1.bf16.msra.mxu0 %v4352_v19  ;;  %3902 = vmatpush3.bf16.msra.mxu1 %v4449_v40  ;;  %v4432_v40 = vld [vmem:[#allocation26 + $0x1a4] ss:$8 sps:$4 sm:$0xff]  }
 0x6f3   :  { %3221 = vmatprep.subr.bf16.mxu0 %v4357_v41  ;;  %3903 = vmatprep.subr.bf16.mxu1 %v4450_v43  ;;  %v4430_v43 = vld [vmem:[#allocation26 + $0x1a0] ss:$8 sps:$4 sm:$0xff]  }
 0x6f6   :  { %3222 = vmatpush1.bf16.msra.mxu0 %v4355_v35  ;;  %3904 = vmatpush3.bf16.msra.mxu1 %v4451_v44  ;;  %v4435_v44 = vld [vmem:[#allocation26 + $0x1b4] ss:$8 sps:$4 sm:$0xff]  }
 0x6f7   :  { %3223 = vmatprep.subr.bf16.mxu0 %v4360_v22  ;;  %3905 = vmatprep.subr.bf16.mxu1 %v4452_v47  ;;  %v4433_v47 = vld [vmem:[#allocation26 + $0x1b0] ss:$8 sps:$4 sm:$0xff]  }
 0x6fa   :  { %3224 = vmatpush1.bf16.msra.mxu0 %v4358_v42  ;;  %3906 = vmatpush3.bf16.msra.mxu1 %v4453_v49  ;;  %v4438_v49 = vld [vmem:[#allocation26 + $0x1c4] ss:$8 sps:$4 sm:$0xff]  }
 0x6fb   :  { %3225 = vmatprep.subr.bf16.mxu0 %v4363_v0  ;;  %3907 = vmatprep.subr.bf16.mxu1 %v4454_v51  ;;  %v4436_v51 = vld [vmem:[#allocation26 + $0x1c0] ss:$8 sps:$4 sm:$0xff]  }
 0x6fe   :  { %3226 = vmatpush1.bf16.msra.mxu0 %v4361_v4  ;;  %3908 = vmatpush3.bf16.msra.mxu1 %v4455_v52  ;;  %v4441_v52 = vld [vmem:[#allocation26 + $0x1d4] ss:$8 sps:$4 sm:$0xff]  }
 0x6ff   :  { %3227 = vmatprep.subr.bf16.mxu0 %v4366_v5  ;;  %3909 = vmatprep.subr.bf16.mxu1 %v4456_v54  ;;  %v4439_v54 = vld [vmem:[#allocation26 + $0x1d0] ss:$8 sps:$4 sm:$0xff]  }
 0x702   :  { %3228 = vmatpush1.bf16.msra.mxu0 %v4364_v50  ;;  %3910 = vmatpush3.bf16.msra.mxu1 %v4457_v55  ;;  %v4444_v55 = vld [vmem:[#allocation26 + $0x1e4] ss:$8 sps:$4 sm:$0xff]  }
 0x703   :  { %3229 = vmatprep.subr.bf16.mxu0 %v4369_v6  ;;  %3911 = vmatprep.subr.bf16.mxu1 %v4458_v56  ;;  %v4442_v56 = vld [vmem:[#allocation26 + $0x1e0] ss:$8 sps:$4 sm:$0xff]  }
 0x706   :  { %3230 = vmatpush1.bf16.msra.mxu0 %v4367_v7 }
 0x707   :  { %3231 = vmatprep.subr.bf16.mxu0 %v4372_v8 }
 0x70a   :  { %3232 = vmatpush1.bf16.msra.mxu0 %v4370_v9 }
 0x70b   :  { %3233 = vmatprep.subr.bf16.mxu0 %v4375_v10 }
 0x70e   :  { %3234 = vmatpush1.bf16.msra.mxu0 %v4373_v11  ;;  %v4400_v11 = vld [vmem:[#allocation26 + $0x100] ss:$8 sps:$4 sm:$0xff]  }
 0x70f   :  { %3235 = vmatprep.subr.bf16.mxu0 %v4378_v12  ;;  %v4405_v12 = vld [vmem:[#allocation26 + $0x114] ss:$8 sps:$4 sm:$0xff]  }
 0x712   :  { %3236 = vmatpush1.bf16.msra.mxu0 %v4376_v13  ;;  %v4403_v13 = vld [vmem:[#allocation26 + $0x110] ss:$8 sps:$4 sm:$0xff]  }
 0x713   :  { %3237 = vmatprep.subr.bf16.mxu0 %v4381_v14  ;;  %v4408_v14 = vld [vmem:[#allocation26 + $0x124] ss:$8 sps:$4 sm:$0xff]  }
 0x716   :  { %3238 = vmatpush1.bf16.msra.mxu0 %v4379_v15  ;;  %v4406_v15 = vld [vmem:[#allocation26 + $0x120] ss:$8 sps:$4 sm:$0xff]  }
 0x717   :  { %3239 = vmatprep.subr.bf16.mxu0 %v4384_v16  ;;  %v4411_v16 = vld [vmem:[#allocation26 + $0x134] ss:$8 sps:$4 sm:$0xff]  }
 0x71a   :  { %3240 = vmatpush1.bf16.msra.mxu0 %v4382_v17  ;;  %v4409_v17 = vld [vmem:[#allocation26 + $0x130] ss:$8 sps:$4 sm:$0xff]  }
 0x71b   :  { %3241 = vmatprep.subr.bf16.mxu0 %v4387_v18  ;;  %v4414_v18 = vld [vmem:[#allocation26 + $0x144] ss:$8 sps:$4 sm:$0xff]  }
 0x71e   :  { %3242 = vmatpush1.bf16.msra.mxu0 %v4385_v20  ;;  %v4412_v20 = vld [vmem:[#allocation26 + $0x140] ss:$8 sps:$4 sm:$0xff]  }
 0x71f   :  { %3243 = vmatprep.subr.bf16.mxu0 %v4390_v21  ;;  %v4417_v21 = vld [vmem:[#allocation26 + $0x154] ss:$8 sps:$4 sm:$0xff]  }
 0x722   :  { %3244 = vmatpush1.bf16.msra.mxu0 %v4388_v24  ;;  %v4415_v24 = vld [vmem:[#allocation26 + $0x150] ss:$8 sps:$4 sm:$0xff]  }
 0x723   :  { %3245 = vmatprep.subr.bf16.mxu0 %v4393_v26  ;;  %v4420_v26 = vld [vmem:[#allocation26 + $0x164] ss:$8 sps:$4 sm:$0xff]  }
 0x726   :  { %3246 = vmatpush1.bf16.msra.mxu0 %v4391_v27  ;;  %v4418_v27 = vld [vmem:[#allocation26 + $0x160] ss:$8 sps:$4 sm:$0xff]  }
 0x727   :  { %3247 = vmatprep.subr.bf16.mxu0 %v4396_v30  ;;  %v4423_v30 = vld [vmem:[#allocation26 + $0x174] ss:$8 sps:$4 sm:$0xff]  }
 0x72a   :  { %3248 = vmatpush1.bf16.msra.mxu0 %v4394_v34  ;;  %v4421_v34 = vld [vmem:[#allocation26 + $0x170] ss:$8 sps:$4 sm:$0xff]  }
 0x72b   :  { %3249 = vmatprep.subr.bf16.mxu0 %v4399_v36  ;;  %v4426_v36 = vld [vmem:[#allocation26 + $0x184] ss:$8 sps:$4 sm:$0xff]  }
 0x72e   :  { %3250 = vmatpush1.bf16.msra.mxu0 %v4397_v37  ;;  %v4424_v37 = vld [vmem:[#allocation26 + $0x180] ss:$8 sps:$4 sm:$0xff]  }
 0x72f   :  { %3262 = vmatprep.subr.bf16.mxu0 %v4402_v38  ;;  %v4429_v38 = vld [vmem:[#allocation26 + $0x194] ss:$8 sps:$4 sm:$0xff]  }
 0x7c4   :  { %v2759_v2 = vpop.f32.mrb[12].mxu0  ;;  %v2802_v62 = vpop.f32.mrb[12].mxu1 }
 0x7c5   :  { %v2760_v53 = vadd.f32 %v2759_v2, %v2388_v58  ;;  %v2803_v60 = vadd.f32 %v2802_v62, %v2396_v59  ;;  %v2761_v1 = vpop.f32.mrb[13].mxu0  ;;  %v2804_v29 = vpop.f32.mrb[13].mxu1  ;;  %v4462_v2 = vld [vmem:[#allocation29 + $0x78] sm:$0xff]  }
 0x7c6   :  { %v2762_v48 = vadd.f32 %v2761_v1, %v2392_v61  ;;  %v2805_v45 = vadd.f32 %v2804_v29, %v2400_v63  ;;  %v2763_v46 = vpop.f32.mrb[14].mxu0  ;;  %v2806_v31 = vpop.f32.mrb[14].mxu1  ;;  %v4463_v62 = vld [vmem:[#allocation29 + $0x38] sm:$0xff]  }
 0x7c7   :  { %v2764_v33 = vadd.f32 %v2763_v46, %v2388_v58  ;;  %v2807_v3 = vadd.f32 %v2806_v31, %v2396_v59  ;;  %v2765_v19 = vpop.f32.mrb[15].mxu0  ;;  %v2808_v41 = vpop.f32.mrb[15].mxu1  ;;  %v2811_v22 = vmax.f32 %v2760_v53, 0.0  ;;  %v2813_v42 = vmax.f32 %v2803_v60, 0.0  ;;  %v4445_v58 = vld [vmem:[#allocation26 + $0x1f0] ss:$8 sps:$4 sm:$0xff]  }
 0x7c8   :  { %v2766_v35 = vadd.f32 %v2765_v19, %v2392_v61  ;;  %v2809_v28 = vadd.f32 %v2808_v41, %v2400_v63  ;;  %v2812_v4 = vmax.f32 %v2762_v48, 0.0  ;;  %v2814_v5 = vmax.f32 %v2805_v45, 0.0  ;;  %v4459_v59 = vld [vmem:[#allocation29 + $0x28] sm:$0xff]   ;;  %v4460_v61 = vld [vmem:[#allocation29 + $0x70] sm:$0xff]   ;;  %v2887_v53 = vld [vmem:[#allocation28] sm:$0x3] }
 0x7c9   :  { %v2815_v0 = vmax.f32 %v2764_v33, 0.0  ;;  %v2817_v32 = vmax.f32 %v2807_v3, 0.0  ;;  %3912 = vmatpush3.bf16.msra.mxu1 %v4459_v59  ;;  %v4461_v63 = vld [vmem:[#allocation29 + $0x30] sm:$0xff]   ;;  %v2892_v60 = vrot.slane %v2887_v53, %v5386_v23  ;;  %v2896_v1 = vrot.slane %v2887_v53, %v5389_v25 }
 0x7ca   :  { %v2816_v50 = vmax.f32 %v2766_v35, 0.0  ;;  %v2818_v6 = vmax.f32 %v2809_v28, 0.0  ;;  %3913 = vmatprep.subr.bf16.mxu1 %v4460_v61 }
 0x7cb   :  { %v2819_v7 = vpack.c.bf16 %v2815_v0, %v2811_v22  ;;  %v5582_v8 = vpack.c.bf16 %v2817_v32, %v2813_v42 }
 0x7cc   :  { %v2820_v9 = vpack.c.bf16 %v2816_v50, %v2812_v4  ;;  %v2822_v10 = vpack.c.bf16 %v2818_v6, %v2814_v5 }
 0x7cd   :  { %3914 = vmatpush3.bf16.msra.mxu1 %v4461_v63 }
 0x7ce   :  { %3251 = vmatprep.mubr.bf16.mxu0 %v2820_v9  ;;  %3915 = vmatprep.subr.bf16.mxu1 %v4462_v2 }
 0x7cf   :  { %3252 = vmatmul.mubr.bf16.vlgmr.msra.gmra.mrb[16].mxu0 %v2819_v7 }
 0x7d0   :  { %3263 = vmatpush1.bf16.msra.mxu0 %v4400_v11  ;;  %3294 = vmatprep.mubr.bf16.mxu0 %v2822_v10 }
 0x7d1   :  { %3264 = vmatprep.subr.bf16.mxu0 %v4405_v12  ;;  %3916 = vmatpush3.bf16.msra.mxu1 %v4463_v62 }
 0x7d4   :  { %3265 = vmatpush1.bf16.msra.mxu0 %v4403_v13 }
 0x7d5   :  { %3266 = vmatprep.subr.bf16.mxu0 %v4408_v14 }
 0x7d8   :  { %3267 = vmatpush1.bf16.msra.mxu0 %v4406_v15 }
 0x7d9   :  { %3268 = vmatprep.subr.bf16.mxu0 %v4411_v16 }
 0x7dc   :  { %3269 = vmatpush1.bf16.msra.mxu0 %v4409_v17 }
 0x7dd   :  { %3270 = vmatprep.subr.bf16.mxu0 %v4414_v18 }
 0x7e0   :  { %3271 = vmatpush1.bf16.msra.mxu0 %v4412_v20 }
 0x7e1   :  { %3272 = vmatprep.subr.bf16.mxu0 %v4417_v21 }
 0x7e4   :  { %3273 = vmatpush1.bf16.msra.mxu0 %v4415_v24 }
 0x7e5   :  { %3274 = vmatprep.subr.bf16.mxu0 %v4420_v26 }
 0x7e8   :  { %3275 = vmatpush1.bf16.msra.mxu0 %v4418_v27 }
 0x7e9   :  { %3276 = vmatprep.subr.bf16.mxu0 %v4423_v30 }
 0x7ec   :  { %3277 = vmatpush1.bf16.msra.mxu0 %v4421_v34 }
 0x7ed   :  { %3278 = vmatprep.subr.bf16.mxu0 %v4426_v36 }
 0x7f0   :  { %3279 = vmatpush1.bf16.msra.mxu0 %v4424_v37 }
 0x7f1   :  { %3280 = vmatprep.subr.bf16.mxu0 %v4429_v38 }
 0x7f4   :  { %3281 = vmatpush1.bf16.msra.mxu0 %v4427_v39 }
 0x7f5   :  { %3282 = vmatprep.subr.bf16.mxu0 %v4432_v40 }
 0x7f8   :  { %3283 = vmatpush1.bf16.msra.mxu0 %v4430_v43 }
 0x7f9   :  { %3284 = vmatprep.subr.bf16.mxu0 %v4435_v44 }
 0x7fc   :  { %3285 = vmatpush1.bf16.msra.mxu0 %v4433_v47 }
 0x7fd   :  { %3286 = vmatprep.subr.bf16.mxu0 %v4438_v49 }
 0x800   :  { %3287 = vmatpush1.bf16.msra.mxu0 %v4436_v51 }
 0x801   :  { %3288 = vmatprep.subr.bf16.mxu0 %v4441_v52 }
 0x804   :  { %3289 = vmatpush1.bf16.msra.mxu0 %v4439_v54 }
 0x805   :  { %3290 = vmatprep.subr.bf16.mxu0 %v4444_v55 }
 0x808   :  { %3291 = vmatpush1.bf16.msra.mxu0 %v4442_v56 }
 0x809   :  { %3292 = vmatprep.subr.bf16.mxu0 %v4447_v57 }
 0x80c   :  { %3293 = vmatpush1.bf16.msra.mxu0 %v4445_v58 }
 0x80f   :  { %3295 = vmatmul.mubr.bf16.vlgmr.msra.gmra.mrb[16].mxu0 %v5582_v8 }
 0x8e2   :  { %v3296_v29 = vpop.f32.mrb[16].mxu0 }
 0x8e3   :  { %v3927_v48 = vadd.f32 %v3296_v29, %v2892_v60  ;;  %v3298_v45 = vpop.f32.mrb[17].mxu0 }
 0x8e4   :  { %v3928_v46 = vadd.f32 %v3298_v45, %v2896_v1  ;;  %v3300_v31 = vpop.f32.mrb[18].mxu0 }
 0x8e5   :  { %v3929_v33 = vadd.f32 %v3300_v31, %v2892_v60  ;;  %v3302_v3 = vpop.f32.mrb[19].mxu0  ;;  %v3305_v41 = vmax.f32 %v3927_v48, 0.0 }
 0x8e6   :  { %v3930_v19 = vadd.f32 %v3302_v3, %v2896_v1  ;;  %v3306_v28 = vmax.f32 %v3928_v46, 0.0 }
 0x8e7   :  { %v3307_v35 = vmax.f32 %v3929_v33, 0.0 }
 0x8e8   :  { %v3308_v22 = vmax.f32 %v3930_v19, 0.0 }
 0x8e9   :  { %v3309_v42 = vpack.c.bf16 %v3307_v35, %v3305_v41 }
 0x8ea   :  { %v3310_v0 = vpack.c.bf16 %v3308_v22, %v3306_v28 }
 0x8ec   :  { %3478 = vmatprep.mubr.bf16.mxu1 %v3310_v0 }
 0x8ed   :  { %3479 = vmatmul.mubr.bf16.vlgmr.msra.gmra.mrb[16].mxu1 %v3309_v42 }
 0x8ee   :  { %4899 = shalt.err (!%p4896_p8)
}
 0x8ef   :  { %s4900_s20 = scalar_lea.hbm %s5660_s25, 256 }
 0x8f0   :  { %p4901_p9 = scmp.ne.s32.totalorder %s5660_s25, %s4900_s20  ;;  %p4904_p10 = scmp.lt.u32.totalorder %s4900_s20, %s5660_s25 }
 0x8f2   :  { %p4906_p11 = pnand %p4904_p10, %p4901_p9 }
 0x8f4   :  { %4909 = shalt.err (!%p4906_p11)
}
 0x8f5   :  { %3528 = dma.vmem_to_hbm [thread:$0]  %s3523_s10, 256, %s5660_s25, [#allocation33], %s4989_s7, %s4989_s7, %s4990_s0  }
 0x8f6   :  { %s5005_s19 = smov [#allocation34]  }
 0x8f7   :  { %s3534_s5 = sshll.u32 %s5005_s19, 4  ;;  %s3535_s5 = int_to_ptr.vmem [resolvable:$true] %s3534_s5 }
 0x8f8   :  { %s4910_s15 = scalar_lea.vmem %s3535_s5, 256  ;;  %p4915_p13 = scmp.lt.s32.totalorder %s3535_s5, %s3535_s5 }
 0x8f9   :  { %p4911_p12 = scmp.ne.s32.totalorder %s3535_s5, %s4910_s15  ;;  %p4916_p0 = scmp.lt.s32.totalorder %s4910_s15, %s4910_s15 }
 0x8fb   :  { %p4917_p1 = por %p4916_p0, %p4915_p13 }
 0x8fd   :  { %p4918_p2 = pnand %p4917_p1, %p4911_p12 }
 0x8ff   :  { %4921 = shalt.err (!%p4918_p2)
}
 0x900   :  { %s4922_s1 = scalar_lea.hbm %s5661_s26, 256 }
 0x901   :  { %p4923_p3 = scmp.ne.s32.totalorder %s5661_s26, %s4922_s1  ;;  %p4926_p4 = scmp.lt.u32.totalorder %s4922_s1, %s5661_s26 }
 0x903   :  { %p4928_p5 = pnand %p4926_p4, %p4923_p3 }
 0x905   :  { %4931 = shalt.err (!%p4928_p5)
}
 0x906   :  { %3540 = dma.vmem_to_hbm [thread:$0]  %s3535_s5, 256, %s5661_s26, [#allocation33], %s4989_s7, %s4989_s7, %s4990_s0  }
 0x907   :  { %v3882_v25 = vld [vmem:[%s5658_s23] ss:$0 sm:$0xff]  ;;  %s5006_s26 = smov [#allocation31]  }
 0x908   :  { %s3510_s21 = sshll.u32 %s5006_s26, 4  ;;  %s3511_s21 = int_to_ptr.vmem [resolvable:$true] %s3510_s21 }
 0x909   :  { %s4932_s23 = scalar_lea.vmem %s3511_s21, 256  ;;  %p4937_p7 = scmp.lt.s32.totalorder %s3511_s21, %s3511_s21 }
 0x90a   :  { %p4933_p6 = scmp.ne.s32.totalorder %s3511_s21, %s4932_s23  ;;  %p4938_p8 = scmp.lt.s32.totalorder %s4932_s23, %s4932_s23 }
 0x90c   :  { %p4939_p9 = por %p4938_p8, %p4937_p7 }
 0x90e   :  { %p4940_p10 = pnand %p4939_p9, %p4933_p6 }
 0x9c0   :  { %v3917_v23 = vpop.f32.mrb[16].mxu1 }
 0x9c1   :  { %v3918_v32 = vpop.f32.mrb[17].mxu1 }
 0x9c2   :  { %v3919_v4 = vadd.f32 %v3918_v32, %v3917_v23  ;;  %v3920_v5 = vpop.f32.mrb[18].mxu1 }
 0x9c3   :  { %v3921_v50 = vpop.f32.mrb[19].mxu1 }
 0x9c4   :  { %v3481_v6 = vadd.f32 %v3919_v4, %v3882_v25  ;;  %v3922_v7 = vadd.f32 %v3921_v50, %v3920_v5 }
 0x9c6   :  { %v3899_v8 = vmul.f32 -1.442695, %v3481_v6  ;;  %v3484_v9 = vadd.f32 %v3922_v7, %v3882_v25 }
 0x9c8   :  { %4484 = vpow2.f32 %v3899_v8  ;;  %v3900_v10 = vmul.f32 -1.442695, %v3484_v9 }
 0x9ca   :  { %4486 = vpow2.f32 %v3900_v10 }
 0x9d2   :  { %v4485_v11 = vpop.eup %4484 }
 0x9d3   :  { %v3493_v12 = vadd.f32 1.0, %v4485_v11 }
 0x9d4   :  { %v4487_v13 = vpop.eup %4486 }
 0x9d5   :  { %4488 = vrcp.f32 %v3493_v12  ;;  %v3494_v14 = vadd.f32 1.0, %v4487_v13 }
 0x9d7   :  { %4490 = vrcp.f32 %v3494_v14 }
 0x9df   :  { %v4489_v15 = vpop.eup %4488 }
 0x9e0   :  { %3499 = vst [vmem:[#allocation31] sm:$0xff] %v4489_v15 }
 0x9e1   :  { %v4491_v16 = vpop.eup %4490 }
 0x9e2   :  { %3500 = vst [vmem:[#allocation31 + $0x8] sm:$0xff] %v4491_v16 }
 0x9e3   :  { %4943 = shalt.err (!%p4940_p10)
}
 0x9e4   :  { %s5695_s13 = sld [smem:[#allocation58_spill]] }
 0x9ea   :  { %s4944_s22 = scalar_lea.hbm %s5695_s13, 256 }
 0x9eb   :  { %p4945_p11 = scmp.ne.s32.totalorder %s5695_s13, %s4944_s22  ;;  %p4948_p12 = scmp.lt.u32.totalorder %s4944_s22, %s5695_s13 }
 0x9ed   :  { %p4950_p13 = pnand %p4948_p12, %p4945_p11 }
 0x9ef   :  { %4953 = shalt.err (!%p4950_p13)
}
 0x9f0   :  { %3516 = dma.vmem_to_hbm [thread:$0]  %s3511_s21, 256, %s5695_s13, [#allocation4], %s4989_s7, %s4989_s7, %s4990_s0  }
 0x9f1   :  { %4974 = dma.done.wait [#allocation4], 256  }
 0x9f2   :  { %4975 = vsyncadd [#allocation4], 4294967040 }
 0x9f3   :  { %4976 = dma.done.wait [#allocation33], 512  }
 0x9f4   :  { %4977 = vsyncadd [#allocation33], 4294966784 }
 0x9f5   :  { %3550 = vsyncpa [#allocation3], 1 }
 0x9f6   :  { %3551 = vsyncpa [#allocation6], 1 }
 0x9f7   :  { %3552 = vsyncpa [#allocation9], 1 }
 0x9f8   :  { %3553 = vsyncpa [#allocation12], 1 }
 0x9f9   :  { %3554 = vsyncpa [#allocation15], 1 }
 0x9fa   :  { %3555 = vsyncpa [#allocation18], 1 }
 0x9fb   :  { %3556 = vsyncpa [#allocation21], 1 }
 0x9fc   :  { %3557 = vsyncpa [#allocation24], 1 }
 0x9fd   :  { %3558 = vsyncpa [#allocation27], 1 }
 0x9fe   :  { %3559 = vsyncpa [#allocation30], 1 }
 0x9ff   :  { %3560 = vsyncpa [#allocation4], 1 }
 0xa00   :  { %3561 = vsyncpa [#allocation33], 1 }

</bundles_post_ra>
